<compile_context>
chip_gen: v6e
topology: v6e:2x2x1
jax: 0.10.0
libtpu: 0.0.40
codegen_flags: <defaults>
</compile_context>

<pallas_src>
import jax
import jax.numpy as jnp
from jax import lax
from jax.experimental import pallas as pl
from jax.experimental.pallas import tpu as pltpu


def lstm_disc_kernel(x_ref, wih_ref, whh_ref, b_ref, fcw_ref, fcb_ref,
                     out_ref, xproj_scr, h_scr, c_scr):
    """x_ref:     (Tt, TB, E)  bf16 time-major embedded tokens, this chunk.
       wih_ref:   (E, 4Hp)     bf16 W_ih^T, gate order [i, f, o, g] (resident).
       whh_ref:   (Hp, 4Hp)    bf16 W_hh^T, same gate order (resident).
       b_ref:     (1, 4Hp)     f32 combined LSTM bias.
       fcw_ref:   (8, Hp)      f32 final FC weight (row 0 real, rows 1-7 zero).
       fcb_ref:   (1, 1)       f32 final FC bias.
       out_ref:   (1, TB)      f32 sigmoid probabilities (lane-dense).
       xproj_scr: (Tt, TB, 4Hp) f32; h_scr / c_scr: (TB, Hp) f32 state."""
    t_idx = pl.program_id(1)
    Tt = x_ref.shape[0]
    Hp = h_scr.shape[1]
    unroll = True if Tt <= 16 else 8

    @pl.when(t_idx == 0)
    def _():
        h_scr[...] = jnp.zeros_like(h_scr)
        c_scr[...] = jnp.zeros_like(c_scr)

    # Hoisted per-chunk input projection (off the serial recurrence path):
    # Tt rank-2 MXU matmuls + bias into the f32 xproj scratch.
    def proj(t, carry):
        xproj_scr[t] = (
            jnp.dot(x_ref[t], wih_ref[...], preferred_element_type=jnp.float32)
            + b_ref[...])
        return carry
    lax.fori_loop(0, Tt, proj, 0, unroll=unroll)

    # Serial recurrence: one MXU op (h @ W_hh^T) per timestep.
    def step(t, carry):
        gates = xproj_scr[t] + jnp.dot(
            h_scr[...].astype(whh_ref.dtype), whh_ref[...],
            preferred_element_type=jnp.float32)
        # Gate order [i, f, o, g]: one wide sigmoid over 3Hp lanes, expressed
        # as 0.5*tanh(0.5*x)+0.5 so each element is a single EUP push.
        sig = 0.5 * jnp.tanh(0.5 * gates[:, 0:3 * Hp]) + 0.5
        i = sig[:, 0 * Hp:1 * Hp]
        f = sig[:, 1 * Hp:2 * Hp]
        o = sig[:, 2 * Hp:3 * Hp]
        g = jnp.tanh(gates[:, 3 * Hp:4 * Hp])
        c_new = f * c_scr[...] + i * g
        h_new = o * jnp.tanh(c_new)
        c_scr[...] = c_new
        h_scr[...] = h_new
        return carry
    lax.fori_loop(0, Tt, step, 0, unroll=unroll)

    # Finalize on the last time chunk: FC + sigmoid, lane-dense (1, TB) write.
    @pl.when(t_idx == pl.num_programs(1) - 1)
    def _():
        logits = jnp.dot(fcw_ref[...], h_scr[...].T,
                         preferred_element_type=jnp.float32)       # (8, TB)
        z = logits[0:1, :] + fcb_ref[...]                           # (1, TB)
        out_ref[...] = 0.5 * jnp.tanh(0.5 * z) + 0.5


def _round_up(x, m):
    return (x + m - 1) // m * m


def _reorder_and_pad_gates(w, H, Hp):
    """Torch gate order [i, f, g, o] -> [i, f, o, g] along axis 0, padding each
    H-row gate block to Hp rows with zeros."""
    i, f, g, o = jnp.split(w, 4, axis=0)
    blocks = [i, f, o, g]
    if Hp != H:
        pad = [(0, Hp - H)] + [(0, 0)] * (w.ndim - 1)
        blocks = [jnp.pad(blk, pad) for blk in blocks]
    return jnp.concatenate(blocks, axis=0)


def _pick_time_chunk(T, TB, Hp, target_bytes=8 << 20):
    """Largest divisor of T whose f32 xproj scratch stays under target_bytes."""
    per_step = TB * 4 * Hp * 4
    max_tt = max(1, min(T, target_bytes // max(per_step, 1)))
    for tt in range(max_tt, 0, -1):
        if T % tt == 0:
            return tt
    return 1


def _derive_vmem_limit(Tt, TB, E, Hp):
    """Scoped-VMEM limit derived from actual block / scratch sizes (+headroom)."""
    bf16, f32 = 2, 4
    stream = 2 * Tt * TB * E * bf16                                  # x chunks
    weights = 2 * ((E + Hp) * 4 * Hp * bf16 + (4 * Hp + 8 * Hp + 1) * f32)
    out = 2 * TB * f32
    scratch = Tt * TB * 4 * Hp * f32 + 2 * TB * Hp * f32
    need = stream + weights + out + scratch
    return int(min(max(need * 5 // 4 + (2 << 20), 32 << 20), 128 << 20))


def discriminator_forward(tokens, params):
    """tokens: (B, T) int32 token ids. Returns (B, 1) float32 probabilities."""
    emb, w_ih, w_hh, b_ih, b_hh, fc_w, fc_b = (
        params["embedding"], params["w_ih"], params["w_hh"],
        params["b_ih"], params["b_hh"], params["fc_w"], params["fc_b"])

    B, T = tokens.shape
    E = emb.shape[1]
    H = w_hh.shape[1]
    Hp = max(128, _round_up(H, 128))          # lane-aligned hidden dim

    # --- parameter prep (XLA glue) ------------------------------------------
    w_ih_r = _reorder_and_pad_gates(w_ih.astype(jnp.float32), H, Hp)  # (4Hp, E)
    w_hh_r = _reorder_and_pad_gates(w_hh.astype(jnp.float32), H, Hp)  # (4Hp, H)
    if Hp != H:
        w_hh_r = jnp.pad(w_hh_r, ((0, 0), (0, Hp - H)))               # (4Hp, Hp)
    b_r = _reorder_and_pad_gates(
        (b_ih + b_hh).astype(jnp.float32)[:, None], H, Hp)[:, 0]      # (4Hp,)

    wih_t = w_ih_r.T.astype(jnp.bfloat16)            # (E, 4Hp)  resident
    whh_t = w_hh_r.T.astype(jnp.bfloat16)            # (Hp, 4Hp) resident
    bias = b_r.reshape(1, 4 * Hp)                    # (1, 4Hp)  f32
    fcw = jnp.zeros((8, Hp), jnp.float32).at[0, :H].set(
        fc_w.reshape(H).astype(jnp.float32))         # (8, Hp) row 0 = fc weight
    fcb = fc_b.reshape(1, 1).astype(jnp.float32)

    # Time-major embedding gather, streamed in bf16.
    x_tbe = jnp.take(emb, tokens.T, axis=0).astype(jnp.bfloat16)      # (T, B, E)

    # --- batch / time tiling --------------------------------------------------
    if B >= 512:
        batch_tile = 256      # fills v6e/v7x 256-wide MXU M dim, >=2 blocks
    elif B >= 128:
        batch_tile = 128      # fills v5e 128-wide MXU M dim
    else:
        batch_tile = _round_up(max(B, 1), 16)   # bf16 sublane tile
    b_pad = _round_up(B, batch_tile)
    if b_pad != B:
        x_tbe = jnp.pad(x_tbe, ((0, 0), (0, b_pad - B), (0, 0)))

    Tt = _pick_time_chunk(T, batch_tile, Hp)
    grid = (b_pad // batch_tile, T // Tt)

    out = pl.pallas_call(
        lstm_disc_kernel,
        out_shape=jax.ShapeDtypeStruct((1, b_pad), jnp.float32),
        grid_spec=pltpu.PrefetchScalarGridSpec(
            num_scalar_prefetch=0,
            grid=grid,
            in_specs=[
                # Streamed embedded-token chunk per (batch tile, time chunk).
                pl.BlockSpec((Tt, batch_tile, E), lambda b, t: (t, b, 0)),
                pl.BlockSpec((E, 4 * Hp), lambda b, t: (0, 0)),   # W_ih^T
                pl.BlockSpec((Hp, 4 * Hp), lambda b, t: (0, 0)),  # W_hh^T
                pl.BlockSpec((1, 4 * Hp), lambda b, t: (0, 0)),   # bias
                pl.BlockSpec((8, Hp), lambda b, t: (0, 0)),       # fc weight
                pl.BlockSpec((1, 1), lambda b, t: (0, 0)),        # fc bias
            ],
            out_specs=pl.BlockSpec((1, batch_tile), lambda b, t: (0, b)),
            scratch_shapes=[
                pltpu.VMEM((Tt, batch_tile, 4 * Hp), jnp.float32),  # xproj
                pltpu.VMEM((batch_tile, Hp), jnp.float32),          # h state
                pltpu.VMEM((batch_tile, Hp), jnp.float32),          # c state
            ],
        ),
        compiler_params=pltpu.CompilerParams(
            dimension_semantics=("parallel", "arbitrary"),
            vmem_limit_bytes=_derive_vmem_limit(Tt, batch_tile, E, Hp),
        ),
    )(x_tbe, wih_t, whh_t, bias, fcw, fcb)

    return out[0, :B].reshape(B, 1)


def make_params(key, vocab_size, embedding_dim, hidden_dim):
    k = 1.0 / jnp.sqrt(jnp.float32(hidden_dim))
    keys = jax.random.split(key, 7)
    return {
        # nn.Embedding default init: N(0, 1)
        "embedding": jax.random.normal(keys[0], (vocab_size, embedding_dim),
                                       jnp.float32),
        # nn.LSTM default init: U(-1/sqrt(H), 1/sqrt(H)), gate order [i,f,g,o]
        "w_ih": jax.random.uniform(keys[1], (4 * hidden_dim, embedding_dim),
                                   jnp.float32, -k, k),
        "w_hh": jax.random.uniform(keys[2], (4 * hidden_dim, hidden_dim),
                                   jnp.float32, -k, k),
        "b_ih": jax.random.uniform(keys[3], (4 * hidden_dim,), jnp.float32, -k, k),
        "b_hh": jax.random.uniform(keys[4], (4 * hidden_dim,), jnp.float32, -k, k),
        # nn.Linear default-ish init: U(-1/sqrt(H), 1/sqrt(H))
        "fc_w": jax.random.uniform(keys[5], (1, hidden_dim), jnp.float32, -k, k),
        "fc_b": jax.random.uniform(keys[6], (1,), jnp.float32, -k, k),
    }


def reference_forward(tokens, params):
    """Pure-JAX f32 reference mirroring torch semantics ([i,f,g,o] order)."""
    emb = jnp.take(params["embedding"], tokens, axis=0)   # (B, T, E)
    H = params["w_hh"].shape[1]
    B = tokens.shape[0]
    h = jnp.zeros((B, H), jnp.float32)
    c = jnp.zeros((B, H), jnp.float32)
    wih_t = params["w_ih"].T
    whh_t = params["w_hh"].T
    b = params["b_ih"] + params["b_hh"]

    def step(carry, x_t):
        h, c = carry
        gates = x_t @ wih_t + h @ whh_t + b
        i = jax.nn.sigmoid(gates[:, 0 * H:1 * H])
        f = jax.nn.sigmoid(gates[:, 1 * H:2 * H])
        g = jnp.tanh(gates[:, 2 * H:3 * H])
        o = jax.nn.sigmoid(gates[:, 3 * H:4 * H])
        c = f * c + i * g
        h = o * jnp.tanh(c)
        return (h, c), None

    (h, _), _ = lax.scan(step, (h, c), jnp.transpose(emb, (1, 0, 2)))
    logits = h @ params["fc_w"].T + params["fc_b"]
    return jax.nn.sigmoid(logits)


if __name__ == "__main__":
    vocab_size, embedding_dim, hidden_dim = 32, 16, 32
    batch, seq_len = 2, 8

    key = jax.random.PRNGKey(0)
    pkey, tkey = jax.random.split(key)
    params = make_params(pkey, vocab_size, embedding_dim, hidden_dim)
    tokens = jax.random.randint(tkey, (batch, seq_len), 0, vocab_size,
                                dtype=jnp.int32)

    out = discriminator_forward(tokens, params)
    out = jax.block_until_ready(out)

    ref = jax.block_until_ready(reference_forward(tokens, params))
    assert out.shape == (batch, 1), out.shape
    # bf16 streamed activations / weights -> looser tolerance vs f32 reference.
    assert jnp.allclose(out, ref, atol=2e-2, rtol=2e-2), (out, ref)

    print("KERNEL_OK")
</pallas_src>

<mosaic_0001>
module attributes {stable_mosaic.version = 11 : i64} {
  func.func @lstm_disc_kernel(%arg0: i32, %arg1: i32, %arg2: memref<8x16x16xbf16, #tpu.memory_space<vmem>>, %arg3: memref<16x512xbf16, #tpu.memory_space<vmem>>, %arg4: memref<128x512xbf16, #tpu.memory_space<vmem>>, %arg5: memref<1x512xf32, #tpu.memory_space<vmem>>, %arg6: memref<8x128xf32, #tpu.memory_space<vmem>>, %arg7: memref<1x1xf32, #tpu.memory_space<vmem>>, %arg8: memref<1x16xf32, #tpu.memory_space<vmem>>, %arg9: memref<8x16x512xf32, #tpu.memory_space<vmem>>, %arg10: memref<16x128xf32, #tpu.memory_space<vmem>>, %arg11: memref<16x128xf32, #tpu.memory_space<vmem>>) attributes {dimension_semantics = [#tpu.dimension_semantics<parallel>, #tpu.dimension_semantics<arbitrary>], iteration_bounds = array<i64: 1, 1>, scalar_prefetch = 0 : i64, scratch_operands = 3 : i64, tpu.core_type = #tpu.core_type<tc>, window_params = [{transform_indices = @transform_0, window_bounds = array<i64: 8, 16, 16>}, {pipeline_mode = #tpu.pipeline_mode<synchronous>, transform_indices = @transform_1, window_bounds = array<i64: 16, 512>}, {pipeline_mode = #tpu.pipeline_mode<synchronous>, transform_indices = @transform_2, window_bounds = array<i64: 128, 512>}, {pipeline_mode = #tpu.pipeline_mode<synchronous>, transform_indices = @transform_3, window_bounds = array<i64: 1, 512>}, {pipeline_mode = #tpu.pipeline_mode<synchronous>, transform_indices = @transform_4, window_bounds = array<i64: 8, 128>}, {pipeline_mode = #tpu.pipeline_mode<synchronous>, transform_indices = @transform_5, window_bounds = array<i64: 1, 1>}, {transform_indices = @transform_6, window_bounds = array<i64: 1, 16>}]} {
    %c0_i32 = arith.constant 0 : i32
    %0 = arith.cmpi eq, %arg1, %c0_i32 : i32
    %1 = arith.extui %0 : i1 to i32
    %c0_i32_0 = arith.constant 0 : i32
    %2 = arith.cmpi ne, %1, %c0_i32_0 : i32
    scf.if %2 {
      %cst_211 = arith.constant 0.000000e+00 : f32
      %334 = vector.broadcast %cst_211 : f32 to vector<16x128xf32>
      %c0_212 = arith.constant 0 : index
      %c0_213 = arith.constant 0 : index
      %335 = vector.load %arg10[%c0_212, %c0_213] : memref<16x128xf32, #tpu.memory_space<vmem>>, vector<16x128xf32>
      tpu.vector_store %arg10[%c0_212, %c0_213], %334 {strides = array<i32>} : memref<16x128xf32, #tpu.memory_space<vmem>>, vector<16x128xf32>,
      %cst_214 = arith.constant 0.000000e+00 : f32
      %336 = vector.broadcast %cst_214 : f32 to vector<16x128xf32>
      %c0_215 = arith.constant 0 : index
      %c0_216 = arith.constant 0 : index
      %337 = vector.load %arg11[%c0_215, %c0_216] : memref<16x128xf32, #tpu.memory_space<vmem>>, vector<16x128xf32>
      tpu.vector_store %arg11[%c0_215, %c0_216], %336 {strides = array<i32>} : memref<16x128xf32, #tpu.memory_space<vmem>>, vector<16x128xf32>,
    } else {
    }
    %c0_i32_1 = arith.constant 0 : i32
    %3 = arith.index_cast %c0_i32_1 : i32 to index
    %c0 = arith.constant 0 : index
    %c0_2 = arith.constant 0 : index
    %4 = vector.load %arg2[%3, %c0, %c0_2] : memref<8x16x16xbf16, #tpu.memory_space<vmem>>, vector<1x16x16xbf16>
    %5 = vector.shape_cast %4 : vector<1x16x16xbf16> to vector<16x16xbf16>
    %c0_3 = arith.constant 0 : index
    %c0_4 = arith.constant 0 : index
    %6 = vector.load %arg3[%c0_3, %c0_4] : memref<16x512xbf16, #tpu.memory_space<vmem>>, vector<16x512xbf16>
    %cst = arith.constant dense<0.000000e+00> : vector<16x512xf32>
    %7 = tpu.matmul %5, %6, %cst {dimension_numbers = #tpu.dot_dimension_numbers<[1], [0], [0], [1], [0, 0, 1, 1], [], []>} : vector<16x16xbf16>, vector<16x512xbf16>, vector<16x512xf32> -> vector<16x512xf32>
    %c0_5 = arith.constant 0 : index
    %c0_6 = arith.constant 0 : index
    %8 = vector.load %arg5[%c0_5, %c0_6] : memref<1x512xf32, #tpu.memory_space<vmem>>, vector<1x512xf32>
    %9 = vector.broadcast %8 : vector<1x512xf32> to vector<16x512xf32>
    %10 = arith.addf %7, %9 : vector<16x512xf32>
    %11 = arith.index_cast %c0_i32_1 : i32 to index
    %c0_7 = arith.constant 0 : index
    %c0_8 = arith.constant 0 : index
    %12 = vector.load %arg9[%11, %c0_7, %c0_8] : memref<8x16x512xf32, #tpu.memory_space<vmem>>, vector<1x16x512xf32>
    %13 = vector.shape_cast %12 : vector<1x16x512xf32> to vector<16x512xf32>
    %14 = vector.shape_cast %10 : vector<16x512xf32> to vector<1x16x512xf32>
    tpu.vector_store %arg9[%11, %c0_7, %c0_8], %14 {strides = array<i32>} : memref<8x16x512xf32, #tpu.memory_space<vmem>>, vector<1x16x512xf32>,
    %c1_i32 = arith.constant 1 : i32
    %15 = arith.index_cast %c1_i32 : i32 to index
    %c0_9 = arith.constant 0 : index
    %c0_10 = arith.constant 0 : index
    %16 = vector.load %arg2[%15, %c0_9, %c0_10] : memref<8x16x16xbf16, #tpu.memory_space<vmem>>, vector<1x16x16xbf16>
    %17 = vector.shape_cast %16 : vector<1x16x16xbf16> to vector<16x16xbf16>
    %c0_11 = arith.constant 0 : index
    %c0_12 = arith.constant 0 : index
    %18 = vector.load %arg3[%c0_11, %c0_12] : memref<16x512xbf16, #tpu.memory_space<vmem>>, vector<16x512xbf16>
    %cst_13 = arith.constant dense<0.000000e+00> : vector<16x512xf32>
    %19 = tpu.matmul %17, %18, %cst_13 {dimension_numbers = #tpu.dot_dimension_numbers<[1], [0], [0], [1], [0, 0, 1, 1], [], []>} : vector<16x16xbf16>, vector<16x512xbf16>, vector<16x512xf32> -> vector<16x512xf32>
    %c0_14 = arith.constant 0 : index
    %c0_15 = arith.constant 0 : index
    %20 = vector.load %arg5[%c0_14, %c0_15] : memref<1x512xf32, #tpu.memory_space<vmem>>, vector<1x512xf32>
    %21 = vector.broadcast %20 : vector<1x512xf32> to vector<16x512xf32>
    %22 = arith.addf %19, %21 : vector<16x512xf32>
    %23 = arith.index_cast %c1_i32 : i32 to index
    %c0_16 = arith.constant 0 : index
    %c0_17 = arith.constant 0 : index
    %24 = vector.load %arg9[%23, %c0_16, %c0_17] : memref<8x16x512xf32, #tpu.memory_space<vmem>>, vector<1x16x512xf32>
    %25 = vector.shape_cast %24 : vector<1x16x512xf32> to vector<16x512xf32>
    %26 = vector.shape_cast %22 : vector<16x512xf32> to vector<1x16x512xf32>
    tpu.vector_store %arg9[%23, %c0_16, %c0_17], %26 {strides = array<i32>} : memref<8x16x512xf32, #tpu.memory_space<vmem>>, vector<1x16x512xf32>,
    %c2_i32 = arith.constant 2 : i32
    %27 = arith.index_cast %c2_i32 : i32 to index
    %c0_18 = arith.constant 0 : index
    %c0_19 = arith.constant 0 : index
    %28 = vector.load %arg2[%27, %c0_18, %c0_19] : memref<8x16x16xbf16, #tpu.memory_space<vmem>>, vector<1x16x16xbf16>
    %29 = vector.shape_cast %28 : vector<1x16x16xbf16> to vector<16x16xbf16>
    %c0_20 = arith.constant 0 : index
    %c0_21 = arith.constant 0 : index
    %30 = vector.load %arg3[%c0_20, %c0_21] : memref<16x512xbf16, #tpu.memory_space<vmem>>, vector<16x512xbf16>
    %cst_22 = arith.constant dense<0.000000e+00> : vector<16x512xf32>
    %31 = tpu.matmul %29, %30, %cst_22 {dimension_numbers = #tpu.dot_dimension_numbers<[1], [0], [0], [1], [0, 0, 1, 1], [], []>} : vector<16x16xbf16>, vector<16x512xbf16>, vector<16x512xf32> -> vector<16x512xf32>
    %c0_23 = arith.constant 0 : index
    %c0_24 = arith.constant 0 : index
    %32 = vector.load %arg5[%c0_23, %c0_24] : memref<1x512xf32, #tpu.memory_space<vmem>>, vector<1x512xf32>
    %33 = vector.broadcast %32 : vector<1x512xf32> to vector<16x512xf32>
    %34 = arith.addf %31, %33 : vector<16x512xf32>
    %35 = arith.index_cast %c2_i32 : i32 to index
    %c0_25 = arith.constant 0 : index
    %c0_26 = arith.constant 0 : index
    %36 = vector.load %arg9[%35, %c0_25, %c0_26] : memref<8x16x512xf32, #tpu.memory_space<vmem>>, vector<1x16x512xf32>
    %37 = vector.shape_cast %36 : vector<1x16x512xf32> to vector<16x512xf32>
    %38 = vector.shape_cast %34 : vector<16x512xf32> to vector<1x16x512xf32>
    tpu.vector_store %arg9[%35, %c0_25, %c0_26], %38 {strides = array<i32>} : memref<8x16x512xf32, #tpu.memory_space<vmem>>, vector<1x16x512xf32>,
    %c3_i32 = arith.constant 3 : i32
    %39 = arith.index_cast %c3_i32 : i32 to index
    %c0_27 = arith.constant 0 : index
    %c0_28 = arith.constant 0 : index
    %40 = vector.load %arg2[%39, %c0_27, %c0_28] : memref<8x16x16xbf16, #tpu.memory_space<vmem>>, vector<1x16x16xbf16>
    %41 = vector.shape_cast %40 : vector<1x16x16xbf16> to vector<16x16xbf16>
    %c0_29 = arith.constant 0 : index
    %c0_30 = arith.constant 0 : index
    %42 = vector.load %arg3[%c0_29, %c0_30] : memref<16x512xbf16, #tpu.memory_space<vmem>>, vector<16x512xbf16>
    %cst_31 = arith.constant dense<0.000000e+00> : vector<16x512xf32>
    %43 = tpu.matmul %41, %42, %cst_31 {dimension_numbers = #tpu.dot_dimension_numbers<[1], [0], [0], [1], [0, 0, 1, 1], [], []>} : vector<16x16xbf16>, vector<16x512xbf16>, vector<16x512xf32> -> vector<16x512xf32>
    %c0_32 = arith.constant 0 : index
    %c0_33 = arith.constant 0 : index
    %44 = vector.load %arg5[%c0_32, %c0_33] : memref<1x512xf32, #tpu.memory_space<vmem>>, vector<1x512xf32>
    %45 = vector.broadcast %44 : vector<1x512xf32> to vector<16x512xf32>
    %46 = arith.addf %43, %45 : vector<16x512xf32>
    %47 = arith.index_cast %c3_i32 : i32 to index
    %c0_34 = arith.constant 0 : index
    %c0_35 = arith.constant 0 : index
    %48 = vector.load %arg9[%47, %c0_34, %c0_35] : memref<8x16x512xf32, #tpu.memory_space<vmem>>, vector<1x16x512xf32>
    %49 = vector.shape_cast %48 : vector<1x16x512xf32> to vector<16x512xf32>
    %50 = vector.shape_cast %46 : vector<16x512xf32> to vector<1x16x512xf32>
    tpu.vector_store %arg9[%47, %c0_34, %c0_35], %50 {strides = array<i32>} : memref<8x16x512xf32, #tpu.memory_space<vmem>>, vector<1x16x512xf32>,
    %c4_i32 = arith.constant 4 : i32
    %51 = arith.index_cast %c4_i32 : i32 to index
    %c0_36 = arith.constant 0 : index
    %c0_37 = arith.constant 0 : index
    %52 = vector.load %arg2[%51, %c0_36, %c0_37] : memref<8x16x16xbf16, #tpu.memory_space<vmem>>, vector<1x16x16xbf16>
    %53 = vector.shape_cast %52 : vector<1x16x16xbf16> to vector<16x16xbf16>
    %c0_38 = arith.constant 0 : index
    %c0_39 = arith.constant 0 : index
    %54 = vector.load %arg3[%c0_38, %c0_39] : memref<16x512xbf16, #tpu.memory_space<vmem>>, vector<16x512xbf16>
    %cst_40 = arith.constant dense<0.000000e+00> : vector<16x512xf32>
    %55 = tpu.matmul %53, %54, %cst_40 {dimension_numbers = #tpu.dot_dimension_numbers<[1], [0], [0], [1], [0, 0, 1, 1], [], []>} : vector<16x16xbf16>, vector<16x512xbf16>, vector<16x512xf32> -> vector<16x512xf32>
    %c0_41 = arith.constant 0 : index
    %c0_42 = arith.constant 0 : index
    %56 = vector.load %arg5[%c0_41, %c0_42] : memref<1x512xf32, #tpu.memory_space<vmem>>, vector<1x512xf32>
    %57 = vector.broadcast %56 : vector<1x512xf32> to vector<16x512xf32>
    %58 = arith.addf %55, %57 : vector<16x512xf32>
    %59 = arith.index_cast %c4_i32 : i32 to index
    %c0_43 = arith.constant 0 : index
    %c0_44 = arith.constant 0 : index
    %60 = vector.load %arg9[%59, %c0_43, %c0_44] : memref<8x16x512xf32, #tpu.memory_space<vmem>>, vector<1x16x512xf32>
    %61 = vector.shape_cast %60 : vector<1x16x512xf32> to vector<16x512xf32>
    %62 = vector.shape_cast %58 : vector<16x512xf32> to vector<1x16x512xf32>
    tpu.vector_store %arg9[%59, %c0_43, %c0_44], %62 {strides = array<i32>} : memref<8x16x512xf32, #tpu.memory_space<vmem>>, vector<1x16x512xf32>,
    %c5_i32 = arith.constant 5 : i32
    %63 = arith.index_cast %c5_i32 : i32 to index
    %c0_45 = arith.constant 0 : index
    %c0_46 = arith.constant 0 : index
    %64 = vector.load %arg2[%63, %c0_45, %c0_46] : memref<8x16x16xbf16, #tpu.memory_space<vmem>>, vector<1x16x16xbf16>
    %65 = vector.shape_cast %64 : vector<1x16x16xbf16> to vector<16x16xbf16>
    %c0_47 = arith.constant 0 : index
    %c0_48 = arith.constant 0 : index
    %66 = vector.load %arg3[%c0_47, %c0_48] : memref<16x512xbf16, #tpu.memory_space<vmem>>, vector<16x512xbf16>
    %cst_49 = arith.constant dense<0.000000e+00> : vector<16x512xf32>
    %67 = tpu.matmul %65, %66, %cst_49 {dimension_numbers = #tpu.dot_dimension_numbers<[1], [0], [0], [1], [0, 0, 1, 1], [], []>} : vector<16x16xbf16>, vector<16x512xbf16>, vector<16x512xf32> -> vector<16x512xf32>
    %c0_50 = arith.constant 0 : index
    %c0_51 = arith.constant 0 : index
    %68 = vector.load %arg5[%c0_50, %c0_51] : memref<1x512xf32, #tpu.memory_space<vmem>>, vector<1x512xf32>
    %69 = vector.broadcast %68 : vector<1x512xf32> to vector<16x512xf32>
    %70 = arith.addf %67, %69 : vector<16x512xf32>
    %71 = arith.index_cast %c5_i32 : i32 to index
    %c0_52 = arith.constant 0 : index
    %c0_53 = arith.constant 0 : index
    %72 = vector.load %arg9[%71, %c0_52, %c0_53] : memref<8x16x512xf32, #tpu.memory_space<vmem>>, vector<1x16x512xf32>
    %73 = vector.shape_cast %72 : vector<1x16x512xf32> to vector<16x512xf32>
    %74 = vector.shape_cast %70 : vector<16x512xf32> to vector<1x16x512xf32>
    tpu.vector_store %arg9[%71, %c0_52, %c0_53], %74 {strides = array<i32>} : memref<8x16x512xf32, #tpu.memory_space<vmem>>, vector<1x16x512xf32>,
    %c6_i32 = arith.constant 6 : i32
    %75 = arith.index_cast %c6_i32 : i32 to index
    %c0_54 = arith.constant 0 : index
    %c0_55 = arith.constant 0 : index
    %76 = vector.load %arg2[%75, %c0_54, %c0_55] : memref<8x16x16xbf16, #tpu.memory_space<vmem>>, vector<1x16x16xbf16>
    %77 = vector.shape_cast %76 : vector<1x16x16xbf16> to vector<16x16xbf16>
    %c0_56 = arith.constant 0 : index
    %c0_57 = arith.constant 0 : index
    %78 = vector.load %arg3[%c0_56, %c0_57] : memref<16x512xbf16, #tpu.memory_space<vmem>>, vector<16x512xbf16>
    %cst_58 = arith.constant dense<0.000000e+00> : vector<16x512xf32>
    %79 = tpu.matmul %77, %78, %cst_58 {dimension_numbers = #tpu.dot_dimension_numbers<[1], [0], [0], [1], [0, 0, 1, 1], [], []>} : vector<16x16xbf16>, vector<16x512xbf16>, vector<16x512xf32> -> vector<16x512xf32>
    %c0_59 = arith.constant 0 : index
    %c0_60 = arith.constant 0 : index
    %80 = vector.load %arg5[%c0_59, %c0_60] : memref<1x512xf32, #tpu.memory_space<vmem>>, vector<1x512xf32>
    %81 = vector.broadcast %80 : vector<1x512xf32> to vector<16x512xf32>
    %82 = arith.addf %79, %81 : vector<16x512xf32>
    %83 = arith.index_cast %c6_i32 : i32 to index
    %c0_61 = arith.constant 0 : index
    %c0_62 = arith.constant 0 : index
    %84 = vector.load %arg9[%83, %c0_61, %c0_62] : memref<8x16x512xf32, #tpu.memory_space<vmem>>, vector<1x16x512xf32>
    %85 = vector.shape_cast %84 : vector<1x16x512xf32> to vector<16x512xf32>
    %86 = vector.shape_cast %82 : vector<16x512xf32> to vector<1x16x512xf32>
    tpu.vector_store %arg9[%83, %c0_61, %c0_62], %86 {strides = array<i32>} : memref<8x16x512xf32, #tpu.memory_space<vmem>>, vector<1x16x512xf32>,
    %c7_i32 = arith.constant 7 : i32
    %87 = arith.index_cast %c7_i32 : i32 to index
    %c0_63 = arith.constant 0 : index
    %c0_64 = arith.constant 0 : index
    %88 = vector.load %arg2[%87, %c0_63, %c0_64] : memref<8x16x16xbf16, #tpu.memory_space<vmem>>, vector<1x16x16xbf16>
    %89 = vector.shape_cast %88 : vector<1x16x16xbf16> to vector<16x16xbf16>
    %c0_65 = arith.constant 0 : index
    %c0_66 = arith.constant 0 : index
    %90 = vector.load %arg3[%c0_65, %c0_66] : memref<16x512xbf16, #tpu.memory_space<vmem>>, vector<16x512xbf16>
    %cst_67 = arith.constant dense<0.000000e+00> : vector<16x512xf32>
    %91 = tpu.matmul %89, %90, %cst_67 {dimension_numbers = #tpu.dot_dimension_numbers<[1], [0], [0], [1], [0, 0, 1, 1], [], []>} : vector<16x16xbf16>, vector<16x512xbf16>, vector<16x512xf32> -> vector<16x512xf32>
    %c0_68 = arith.constant 0 : index
    %c0_69 = arith.constant 0 : index
    %92 = vector.load %arg5[%c0_68, %c0_69] : memref<1x512xf32, #tpu.memory_space<vmem>>, vector<1x512xf32>
    %93 = vector.broadcast %92 : vector<1x512xf32> to vector<16x512xf32>
    %94 = arith.addf %91, %93 : vector<16x512xf32>
    %95 = arith.index_cast %c7_i32 : i32 to index
    %c0_70 = arith.constant 0 : index
    %c0_71 = arith.constant 0 : index
    %96 = vector.load %arg9[%95, %c0_70, %c0_71] : memref<8x16x512xf32, #tpu.memory_space<vmem>>, vector<1x16x512xf32>
    %97 = vector.shape_cast %96 : vector<1x16x512xf32> to vector<16x512xf32>
    %98 = vector.shape_cast %94 : vector<16x512xf32> to vector<1x16x512xf32>
    tpu.vector_store %arg9[%95, %c0_70, %c0_71], %98 {strides = array<i32>} : memref<8x16x512xf32, #tpu.memory_space<vmem>>, vector<1x16x512xf32>,
    %c8_i32 = arith.constant 8 : i32
    %c0_i32_72 = arith.constant 0 : i32
    %99 = arith.index_cast %c0_i32_72 : i32 to index
    %c0_73 = arith.constant 0 : index
    %c0_74 = arith.constant 0 : index
    %100 = vector.load %arg9[%99, %c0_73, %c0_74] : memref<8x16x512xf32, #tpu.memory_space<vmem>>, vector<1x16x512xf32>
    %101 = vector.shape_cast %100 : vector<1x16x512xf32> to vector<16x512xf32>
    %c0_75 = arith.constant 0 : index
    %c0_76 = arith.constant 0 : index
    %102 = vector.load %arg10[%c0_75, %c0_76] : memref<16x128xf32, #tpu.memory_space<vmem>>, vector<16x128xf32>
    %103 = arith.truncf %102 : vector<16x128xf32> to vector<16x128xbf16>
    %c0_77 = arith.constant 0 : index
    %c0_78 = arith.constant 0 : index
    %104 = vector.load %arg4[%c0_77, %c0_78] : memref<128x512xbf16, #tpu.memory_space<vmem>>, vector<128x512xbf16>
    %cst_79 = arith.constant dense<0.000000e+00> : vector<16x512xf32>
    %105 = tpu.matmul %103, %104, %cst_79 {dimension_numbers = #tpu.dot_dimension_numbers<[1], [0], [0], [1], [0, 0, 1, 1], [], []>} : vector<16x128xbf16>, vector<128x512xbf16>, vector<16x512xf32> -> vector<16x512xf32>
    %106 = arith.addf %101, %105 : vector<16x512xf32>
    %107 = vector.extract_strided_slice %106 {offsets = [0, 0], sizes = [16, 384], strides = [1, 1]} : vector<16x512xf32> to vector<16x384xf32>
    %cst_80 = arith.constant 5.000000e-01 : f32
    %108 = vector.broadcast %cst_80 : f32 to vector<16x384xf32>
    %109 = arith.mulf %108, %107 : vector<16x384xf32>
    %110 = math.tanh %109 : vector<16x384xf32>
    %cst_81 = arith.constant 5.000000e-01 : f32
    %111 = vector.broadcast %cst_81 : f32 to vector<16x384xf32>
    %112 = arith.mulf %111, %110 : vector<16x384xf32>
    %cst_82 = arith.constant 5.000000e-01 : f32
    %113 = vector.broadcast %cst_82 : f32 to vector<16x384xf32>
    %114 = arith.addf %112, %113 : vector<16x384xf32>
    %115 = vector.extract_strided_slice %114 {offsets = [0, 0], sizes = [16, 128], strides = [1, 1]} : vector<16x384xf32> to vector<16x128xf32>
    %116 = vector.extract_strided_slice %114 {offsets = [0, 128], sizes = [16, 128], strides = [1, 1]} : vector<16x384xf32> to vector<16x128xf32>
    %117 = vector.extract_strided_slice %114 {offsets = [0, 256], sizes = [16, 128], strides = [1, 1]} : vector<16x384xf32> to vector<16x128xf32>
    %118 = vector.extract_strided_slice %106 {offsets = [0, 384], sizes = [16, 128], strides = [1, 1]} : vector<16x512xf32> to vector<16x128xf32>
    %119 = math.tanh %118 : vector<16x128xf32>
    %c0_83 = arith.constant 0 : index
    %c0_84 = arith.constant 0 : index
    %120 = vector.load %arg11[%c0_83, %c0_84] : memref<16x128xf32, #tpu.memory_space<vmem>>, vector<16x128xf32>
    %121 = arith.mulf %116, %120 : vector<16x128xf32>
    %122 = arith.mulf %115, %119 : vector<16x128xf32>
    %123 = arith.addf %121, %122 : vector<16x128xf32>
    %124 = math.tanh %123 : vector<16x128xf32>
    %125 = arith.mulf %117, %124 : vector<16x128xf32>
    %c0_85 = arith.constant 0 : index
    %c0_86 = arith.constant 0 : index
    %126 = vector.load %arg11[%c0_85, %c0_86] : memref<16x128xf32, #tpu.memory_space<vmem>>, vector<16x128xf32>
    tpu.vector_store %arg11[%c0_85, %c0_86], %123 {strides = array<i32>} : memref<16x128xf32, #tpu.memory_space<vmem>>, vector<16x128xf32>,
    %c0_87 = arith.constant 0 : index
    %c0_88 = arith.constant 0 : index
    %127 = vector.load %arg10[%c0_87, %c0_88] : memref<16x128xf32, #tpu.memory_space<vmem>>, vector<16x128xf32>
    tpu.vector_store %arg10[%c0_87, %c0_88], %125 {strides = array<i32>} : memref<16x128xf32, #tpu.memory_space<vmem>>, vector<16x128xf32>,
    %c1_i32_89 = arith.constant 1 : i32
    %128 = arith.index_cast %c1_i32_89 : i32 to index
    %c0_90 = arith.constant 0 : index
    %c0_91 = arith.constant 0 : index
    %129 = vector.load %arg9[%128, %c0_90, %c0_91] : memref<8x16x512xf32, #tpu.memory_space<vmem>>, vector<1x16x512xf32>
    %130 = vector.shape_cast %129 : vector<1x16x512xf32> to vector<16x512xf32>
    %c0_92 = arith.constant 0 : index
    %c0_93 = arith.constant 0 : index
    %131 = vector.load %arg10[%c0_92, %c0_93] : memref<16x128xf32, #tpu.memory_space<vmem>>, vector<16x128xf32>
    %132 = arith.truncf %131 : vector<16x128xf32> to vector<16x128xbf16>
    %c0_94 = arith.constant 0 : index
    %c0_95 = arith.constant 0 : index
    %133 = vector.load %arg4[%c0_94, %c0_95] : memref<128x512xbf16, #tpu.memory_space<vmem>>, vector<128x512xbf16>
    %cst_96 = arith.constant dense<0.000000e+00> : vector<16x512xf32>
    %134 = tpu.matmul %132, %133, %cst_96 {dimension_numbers = #tpu.dot_dimension_numbers<[1], [0], [0], [1], [0, 0, 1, 1], [], []>} : vector<16x128xbf16>, vector<128x512xbf16>, vector<16x512xf32> -> vector<16x512xf32>
    %135 = arith.addf %130, %134 : vector<16x512xf32>
    %136 = vector.extract_strided_slice %135 {offsets = [0, 0], sizes = [16, 384], strides = [1, 1]} : vector<16x512xf32> to vector<16x384xf32>
    %cst_97 = arith.constant 5.000000e-01 : f32
    %137 = vector.broadcast %cst_97 : f32 to vector<16x384xf32>
    %138 = arith.mulf %137, %136 : vector<16x384xf32>
    %139 = math.tanh %138 : vector<16x384xf32>
    %cst_98 = arith.constant 5.000000e-01 : f32
    %140 = vector.broadcast %cst_98 : f32 to vector<16x384xf32>
    %141 = arith.mulf %140, %139 : vector<16x384xf32>
    %cst_99 = arith.constant 5.000000e-01 : f32
    %142 = vector.broadcast %cst_99 : f32 to vector<16x384xf32>
    %143 = arith.addf %141, %142 : vector<16x384xf32>
    %144 = vector.extract_strided_slice %143 {offsets = [0, 0], sizes = [16, 128], strides = [1, 1]} : vector<16x384xf32> to vector<16x128xf32>
    %145 = vector.extract_strided_slice %143 {offsets = [0, 128], sizes = [16, 128], strides = [1, 1]} : vector<16x384xf32> to vector<16x128xf32>
    %146 = vector.extract_strided_slice %143 {offsets = [0, 256], sizes = [16, 128], strides = [1, 1]} : vector<16x384xf32> to vector<16x128xf32>
    %147 = vector.extract_strided_slice %135 {offsets = [0, 384], sizes = [16, 128], strides = [1, 1]} : vector<16x512xf32> to vector<16x128xf32>
    %148 = math.tanh %147 : vector<16x128xf32>
    %c0_100 = arith.constant 0 : index
    %c0_101 = arith.constant 0 : index
    %149 = vector.load %arg11[%c0_100, %c0_101] : memref<16x128xf32, #tpu.memory_space<vmem>>, vector<16x128xf32>
    %150 = arith.mulf %145, %149 : vector<16x128xf32>
    %151 = arith.mulf %144, %148 : vector<16x128xf32>
    %152 = arith.addf %150, %151 : vector<16x128xf32>
    %153 = math.tanh %152 : vector<16x128xf32>
    %154 = arith.mulf %146, %153 : vector<16x128xf32>
    %c0_102 = arith.constant 0 : index
    %c0_103 = arith.constant 0 : index
    %155 = vector.load %arg11[%c0_102, %c0_103] : memref<16x128xf32, #tpu.memory_space<vmem>>, vector<16x128xf32>
    tpu.vector_store %arg11[%c0_102, %c0_103], %152 {strides = array<i32>} : memref<16x128xf32, #tpu.memory_space<vmem>>, vector<16x128xf32>,
    %c0_104 = arith.constant 0 : index
    %c0_105 = arith.constant 0 : index
    %156 = vector.load %arg10[%c0_104, %c0_105] : memref<16x128xf32, #tpu.memory_space<vmem>>, vector<16x128xf32>
    tpu.vector_store %arg10[%c0_104, %c0_105], %154 {strides = array<i32>} : memref<16x128xf32, #tpu.memory_space<vmem>>, vector<16x128xf32>,
    %c2_i32_106 = arith.constant 2 : i32
    %157 = arith.index_cast %c2_i32_106 : i32 to index
    %c0_107 = arith.constant 0 : index
    %c0_108 = arith.constant 0 : index
    %158 = vector.load %arg9[%157, %c0_107, %c0_108] : memref<8x16x512xf32, #tpu.memory_space<vmem>>, vector<1x16x512xf32>
    %159 = vector.shape_cast %158 : vector<1x16x512xf32> to vector<16x512xf32>
    %c0_109 = arith.constant 0 : index
    %c0_110 = arith.constant 0 : index
    %160 = vector.load %arg10[%c0_109, %c0_110] : memref<16x128xf32, #tpu.memory_space<vmem>>, vector<16x128xf32>
    %161 = arith.truncf %160 : vector<16x128xf32> to vector<16x128xbf16>
    %c0_111 = arith.constant 0 : index
    %c0_112 = arith.constant 0 : index
    %162 = vector.load %arg4[%c0_111, %c0_112] : memref<128x512xbf16, #tpu.memory_space<vmem>>, vector<128x512xbf16>
    %cst_113 = arith.constant dense<0.000000e+00> : vector<16x512xf32>
    %163 = tpu.matmul %161, %162, %cst_113 {dimension_numbers = #tpu.dot_dimension_numbers<[1], [0], [0], [1], [0, 0, 1, 1], [], []>} : vector<16x128xbf16>, vector<128x512xbf16>, vector<16x512xf32> -> vector<16x512xf32>
    %164 = arith.addf %159, %163 : vector<16x512xf32>
    %165 = vector.extract_strided_slice %164 {offsets = [0, 0], sizes = [16, 384], strides = [1, 1]} : vector<16x512xf32> to vector<16x384xf32>
    %cst_114 = arith.constant 5.000000e-01 : f32
    %166 = vector.broadcast %cst_114 : f32 to vector<16x384xf32>
    %167 = arith.mulf %166, %165 : vector<16x384xf32>
    %168 = math.tanh %167 : vector<16x384xf32>
    %cst_115 = arith.constant 5.000000e-01 : f32
    %169 = vector.broadcast %cst_115 : f32 to vector<16x384xf32>
    %170 = arith.mulf %169, %168 : vector<16x384xf32>
    %cst_116 = arith.constant 5.000000e-01 : f32
    %171 = vector.broadcast %cst_116 : f32 to vector<16x384xf32>
    %172 = arith.addf %170, %171 : vector<16x384xf32>
    %173 = vector.extract_strided_slice %172 {offsets = [0, 0], sizes = [16, 128], strides = [1, 1]} : vector<16x384xf32> to vector<16x128xf32>
    %174 = vector.extract_strided_slice %172 {offsets = [0, 128], sizes = [16, 128], strides = [1, 1]} : vector<16x384xf32> to vector<16x128xf32>
    %175 = vector.extract_strided_slice %172 {offsets = [0, 256], sizes = [16, 128], strides = [1, 1]} : vector<16x384xf32> to vector<16x128xf32>
    %176 = vector.extract_strided_slice %164 {offsets = [0, 384], sizes = [16, 128], strides = [1, 1]} : vector<16x512xf32> to vector<16x128xf32>
    %177 = math.tanh %176 : vector<16x128xf32>
    %c0_117 = arith.constant 0 : index
    %c0_118 = arith.constant 0 : index
    %178 = vector.load %arg11[%c0_117, %c0_118] : memref<16x128xf32, #tpu.memory_space<vmem>>, vector<16x128xf32>
    %179 = arith.mulf %174, %178 : vector<16x128xf32>
    %180 = arith.mulf %173, %177 : vector<16x128xf32>
    %181 = arith.addf %179, %180 : vector<16x128xf32>
    %182 = math.tanh %181 : vector<16x128xf32>
    %183 = arith.mulf %175, %182 : vector<16x128xf32>
    %c0_119 = arith.constant 0 : index
    %c0_120 = arith.constant 0 : index
    %184 = vector.load %arg11[%c0_119, %c0_120] : memref<16x128xf32, #tpu.memory_space<vmem>>, vector<16x128xf32>
    tpu.vector_store %arg11[%c0_119, %c0_120], %181 {strides = array<i32>} : memref<16x128xf32, #tpu.memory_space<vmem>>, vector<16x128xf32>,
    %c0_121 = arith.constant 0 : index
    %c0_122 = arith.constant 0 : index
    %185 = vector.load %arg10[%c0_121, %c0_122] : memref<16x128xf32, #tpu.memory_space<vmem>>, vector<16x128xf32>
    tpu.vector_store %arg10[%c0_121, %c0_122], %183 {strides = array<i32>} : memref<16x128xf32, #tpu.memory_space<vmem>>, vector<16x128xf32>,
    %c3_i32_123 = arith.constant 3 : i32
    %186 = arith.index_cast %c3_i32_123 : i32 to index
    %c0_124 = arith.constant 0 : index
    %c0_125 = arith.constant 0 : index
    %187 = vector.load %arg9[%186, %c0_124, %c0_125] : memref<8x16x512xf32, #tpu.memory_space<vmem>>, vector<1x16x512xf32>
    %188 = vector.shape_cast %187 : vector<1x16x512xf32> to vector<16x512xf32>
    %c0_126 = arith.constant 0 : index
    %c0_127 = arith.constant 0 : index
    %189 = vector.load %arg10[%c0_126, %c0_127] : memref<16x128xf32, #tpu.memory_space<vmem>>, vector<16x128xf32>
    %190 = arith.truncf %189 : vector<16x128xf32> to vector<16x128xbf16>
    %c0_128 = arith.constant 0 : index
    %c0_129 = arith.constant 0 : index
    %191 = vector.load %arg4[%c0_128, %c0_129] : memref<128x512xbf16, #tpu.memory_space<vmem>>, vector<128x512xbf16>
    %cst_130 = arith.constant dense<0.000000e+00> : vector<16x512xf32>
    %192 = tpu.matmul %190, %191, %cst_130 {dimension_numbers = #tpu.dot_dimension_numbers<[1], [0], [0], [1], [0, 0, 1, 1], [], []>} : vector<16x128xbf16>, vector<128x512xbf16>, vector<16x512xf32> -> vector<16x512xf32>
    %193 = arith.addf %188, %192 : vector<16x512xf32>
    %194 = vector.extract_strided_slice %193 {offsets = [0, 0], sizes = [16, 384], strides = [1, 1]} : vector<16x512xf32> to vector<16x384xf32>
    %cst_131 = arith.constant 5.000000e-01 : f32
    %195 = vector.broadcast %cst_131 : f32 to vector<16x384xf32>
    %196 = arith.mulf %195, %194 : vector<16x384xf32>
    %197 = math.tanh %196 : vector<16x384xf32>
    %cst_132 = arith.constant 5.000000e-01 : f32
    %198 = vector.broadcast %cst_132 : f32 to vector<16x384xf32>
    %199 = arith.mulf %198, %197 : vector<16x384xf32>
    %cst_133 = arith.constant 5.000000e-01 : f32
    %200 = vector.broadcast %cst_133 : f32 to vector<16x384xf32>
    %201 = arith.addf %199, %200 : vector<16x384xf32>
    %202 = vector.extract_strided_slice %201 {offsets = [0, 0], sizes = [16, 128], strides = [1, 1]} : vector<16x384xf32> to vector<16x128xf32>
    %203 = vector.extract_strided_slice %201 {offsets = [0, 128], sizes = [16, 128], strides = [1, 1]} : vector<16x384xf32> to vector<16x128xf32>
    %204 = vector.extract_strided_slice %201 {offsets = [0, 256], sizes = [16, 128], strides = [1, 1]} : vector<16x384xf32> to vector<16x128xf32>
    %205 = vector.extract_strided_slice %193 {offsets = [0, 384], sizes = [16, 128], strides = [1, 1]} : vector<16x512xf32> to vector<16x128xf32>
    %206 = math.tanh %205 : vector<16x128xf32>
    %c0_134 = arith.constant 0 : index
    %c0_135 = arith.constant 0 : index
    %207 = vector.load %arg11[%c0_134, %c0_135] : memref<16x128xf32, #tpu.memory_space<vmem>>, vector<16x128xf32>
    %208 = arith.mulf %203, %207 : vector<16x128xf32>
    %209 = arith.mulf %202, %206 : vector<16x128xf32>
    %210 = arith.addf %208, %209 : vector<16x128xf32>
    %211 = math.tanh %210 : vector<16x128xf32>
    %212 = arith.mulf %204, %211 : vector<16x128xf32>
    %c0_136 = arith.constant 0 : index
    %c0_137 = arith.constant 0 : index
    %213 = vector.load %arg11[%c0_136, %c0_137] : memref<16x128xf32, #tpu.memory_space<vmem>>, vector<16x128xf32>
    tpu.vector_store %arg11[%c0_136, %c0_137], %210 {strides = array<i32>} : memref<16x128xf32, #tpu.memory_space<vmem>>, vector<16x128xf32>,
    %c0_138 = arith.constant 0 : index
    %c0_139 = arith.constant 0 : index
    %214 = vector.load %arg10[%c0_138, %c0_139] : memref<16x128xf32, #tpu.memory_space<vmem>>, vector<16x128xf32>
    tpu.vector_store %arg10[%c0_138, %c0_139], %212 {strides = array<i32>} : memref<16x128xf32, #tpu.memory_space<vmem>>, vector<16x128xf32>,
    %c4_i32_140 = arith.constant 4 : i32
    %215 = arith.index_cast %c4_i32_140 : i32 to index
    %c0_141 = arith.constant 0 : index
    %c0_142 = arith.constant 0 : index
    %216 = vector.load %arg9[%215, %c0_141, %c0_142] : memref<8x16x512xf32, #tpu.memory_space<vmem>>, vector<1x16x512xf32>
    %217 = vector.shape_cast %216 : vector<1x16x512xf32> to vector<16x512xf32>
    %c0_143 = arith.constant 0 : index
    %c0_144 = arith.constant 0 : index
    %218 = vector.load %arg10[%c0_143, %c0_144] : memref<16x128xf32, #tpu.memory_space<vmem>>, vector<16x128xf32>
    %219 = arith.truncf %218 : vector<16x128xf32> to vector<16x128xbf16>
    %c0_145 = arith.constant 0 : index
    %c0_146 = arith.constant 0 : index
    %220 = vector.load %arg4[%c0_145, %c0_146] : memref<128x512xbf16, #tpu.memory_space<vmem>>, vector<128x512xbf16>
    %cst_147 = arith.constant dense<0.000000e+00> : vector<16x512xf32>
    %221 = tpu.matmul %219, %220, %cst_147 {dimension_numbers = #tpu.dot_dimension_numbers<[1], [0], [0], [1], [0, 0, 1, 1], [], []>} : vector<16x128xbf16>, vector<128x512xbf16>, vector<16x512xf32> -> vector<16x512xf32>
    %222 = arith.addf %217, %221 : vector<16x512xf32>
    %223 = vector.extract_strided_slice %222 {offsets = [0, 0], sizes = [16, 384], strides = [1, 1]} : vector<16x512xf32> to vector<16x384xf32>
    %cst_148 = arith.constant 5.000000e-01 : f32
    %224 = vector.broadcast %cst_148 : f32 to vector<16x384xf32>
    %225 = arith.mulf %224, %223 : vector<16x384xf32>
    %226 = math.tanh %225 : vector<16x384xf32>
    %cst_149 = arith.constant 5.000000e-01 : f32
    %227 = vector.broadcast %cst_149 : f32 to vector<16x384xf32>
    %228 = arith.mulf %227, %226 : vector<16x384xf32>
    %cst_150 = arith.constant 5.000000e-01 : f32
    %229 = vector.broadcast %cst_150 : f32 to vector<16x384xf32>
    %230 = arith.addf %228, %229 : vector<16x384xf32>
    %231 = vector.extract_strided_slice %230 {offsets = [0, 0], sizes = [16, 128], strides = [1, 1]} : vector<16x384xf32> to vector<16x128xf32>
    %232 = vector.extract_strided_slice %230 {offsets = [0, 128], sizes = [16, 128], strides = [1, 1]} : vector<16x384xf32> to vector<16x128xf32>
    %233 = vector.extract_strided_slice %230 {offsets = [0, 256], sizes = [16, 128], strides = [1, 1]} : vector<16x384xf32> to vector<16x128xf32>
    %234 = vector.extract_strided_slice %222 {offsets = [0, 384], sizes = [16, 128], strides = [1, 1]} : vector<16x512xf32> to vector<16x128xf32>
    %235 = math.tanh %234 : vector<16x128xf32>
    %c0_151 = arith.constant 0 : index
    %c0_152 = arith.constant 0 : index
    %236 = vector.load %arg11[%c0_151, %c0_152] : memref<16x128xf32, #tpu.memory_space<vmem>>, vector<16x128xf32>
    %237 = arith.mulf %232, %236 : vector<16x128xf32>
    %238 = arith.mulf %231, %235 : vector<16x128xf32>
    %239 = arith.addf %237, %238 : vector<16x128xf32>
    %240 = math.tanh %239 : vector<16x128xf32>
    %241 = arith.mulf %233, %240 : vector<16x128xf32>
    %c0_153 = arith.constant 0 : index
    %c0_154 = arith.constant 0 : index
    %242 = vector.load %arg11[%c0_153, %c0_154] : memref<16x128xf32, #tpu.memory_space<vmem>>, vector<16x128xf32>
    tpu.vector_store %arg11[%c0_153, %c0_154], %239 {strides = array<i32>} : memref<16x128xf32, #tpu.memory_space<vmem>>, vector<16x128xf32>,
    %c0_155 = arith.constant 0 : index
    %c0_156 = arith.constant 0 : index
    %243 = vector.load %arg10[%c0_155, %c0_156] : memref<16x128xf32, #tpu.memory_space<vmem>>, vector<16x128xf32>
    tpu.vector_store %arg10[%c0_155, %c0_156], %241 {strides = array<i32>} : memref<16x128xf32, #tpu.memory_space<vmem>>, vector<16x128xf32>,
    %c5_i32_157 = arith.constant 5 : i32
    %244 = arith.index_cast %c5_i32_157 : i32 to index
    %c0_158 = arith.constant 0 : index
    %c0_159 = arith.constant 0 : index
    %245 = vector.load %arg9[%244, %c0_158, %c0_159] : memref<8x16x512xf32, #tpu.memory_space<vmem>>, vector<1x16x512xf32>
    %246 = vector.shape_cast %245 : vector<1x16x512xf32> to vector<16x512xf32>
    %c0_160 = arith.constant 0 : index
    %c0_161 = arith.constant 0 : index
    %247 = vector.load %arg10[%c0_160, %c0_161] : memref<16x128xf32, #tpu.memory_space<vmem>>, vector<16x128xf32>
    %248 = arith.truncf %247 : vector<16x128xf32> to vector<16x128xbf16>
    %c0_162 = arith.constant 0 : index
    %c0_163 = arith.constant 0 : index
    %249 = vector.load %arg4[%c0_162, %c0_163] : memref<128x512xbf16, #tpu.memory_space<vmem>>, vector<128x512xbf16>
    %cst_164 = arith.constant dense<0.000000e+00> : vector<16x512xf32>
    %250 = tpu.matmul %248, %249, %cst_164 {dimension_numbers = #tpu.dot_dimension_numbers<[1], [0], [0], [1], [0, 0, 1, 1], [], []>} : vector<16x128xbf16>, vector<128x512xbf16>, vector<16x512xf32> -> vector<16x512xf32>
    %251 = arith.addf %246, %250 : vector<16x512xf32>
    %252 = vector.extract_strided_slice %251 {offsets = [0, 0], sizes = [16, 384], strides = [1, 1]} : vector<16x512xf32> to vector<16x384xf32>
    %cst_165 = arith.constant 5.000000e-01 : f32
    %253 = vector.broadcast %cst_165 : f32 to vector<16x384xf32>
    %254 = arith.mulf %253, %252 : vector<16x384xf32>
    %255 = math.tanh %254 : vector<16x384xf32>
    %cst_166 = arith.constant 5.000000e-01 : f32
    %256 = vector.broadcast %cst_166 : f32 to vector<16x384xf32>
    %257 = arith.mulf %256, %255 : vector<16x384xf32>
    %cst_167 = arith.constant 5.000000e-01 : f32
    %258 = vector.broadcast %cst_167 : f32 to vector<16x384xf32>
    %259 = arith.addf %257, %258 : vector<16x384xf32>
    %260 = vector.extract_strided_slice %259 {offsets = [0, 0], sizes = [16, 128], strides = [1, 1]} : vector<16x384xf32> to vector<16x128xf32>
    %261 = vector.extract_strided_slice %259 {offsets = [0, 128], sizes = [16, 128], strides = [1, 1]} : vector<16x384xf32> to vector<16x128xf32>
    %262 = vector.extract_strided_slice %259 {offsets = [0, 256], sizes = [16, 128], strides = [1, 1]} : vector<16x384xf32> to vector<16x128xf32>
    %263 = vector.extract_strided_slice %251 {offsets = [0, 384], sizes = [16, 128], strides = [1, 1]} : vector<16x512xf32> to vector<16x128xf32>
    %264 = math.tanh %263 : vector<16x128xf32>
    %c0_168 = arith.constant 0 : index
    %c0_169 = arith.constant 0 : index
    %265 = vector.load %arg11[%c0_168, %c0_169] : memref<16x128xf32, #tpu.memory_space<vmem>>, vector<16x128xf32>
    %266 = arith.mulf %261, %265 : vector<16x128xf32>
    %267 = arith.mulf %260, %264 : vector<16x128xf32>
    %268 = arith.addf %266, %267 : vector<16x128xf32>
    %269 = math.tanh %268 : vector<16x128xf32>
    %270 = arith.mulf %262, %269 : vector<16x128xf32>
    %c0_170 = arith.constant 0 : index
    %c0_171 = arith.constant 0 : index
    %271 = vector.load %arg11[%c0_170, %c0_171] : memref<16x128xf32, #tpu.memory_space<vmem>>, vector<16x128xf32>
    tpu.vector_store %arg11[%c0_170, %c0_171], %268 {strides = array<i32>} : memref<16x128xf32, #tpu.memory_space<vmem>>, vector<16x128xf32>,
    %c0_172 = arith.constant 0 : index
    %c0_173 = arith.constant 0 : index
    %272 = vector.load %arg10[%c0_172, %c0_173] : memref<16x128xf32, #tpu.memory_space<vmem>>, vector<16x128xf32>
    tpu.vector_store %arg10[%c0_172, %c0_173], %270 {strides = array<i32>} : memref<16x128xf32, #tpu.memory_space<vmem>>, vector<16x128xf32>,
    %c6_i32_174 = arith.constant 6 : i32
    %273 = arith.index_cast %c6_i32_174 : i32 to index
    %c0_175 = arith.constant 0 : index
    %c0_176 = arith.constant 0 : index
    %274 = vector.load %arg9[%273, %c0_175, %c0_176] : memref<8x16x512xf32, #tpu.memory_space<vmem>>, vector<1x16x512xf32>
    %275 = vector.shape_cast %274 : vector<1x16x512xf32> to vector<16x512xf32>
    %c0_177 = arith.constant 0 : index
    %c0_178 = arith.constant 0 : index
    %276 = vector.load %arg10[%c0_177, %c0_178] : memref<16x128xf32, #tpu.memory_space<vmem>>, vector<16x128xf32>
    %277 = arith.truncf %276 : vector<16x128xf32> to vector<16x128xbf16>
    %c0_179 = arith.constant 0 : index
    %c0_180 = arith.constant 0 : index
    %278 = vector.load %arg4[%c0_179, %c0_180] : memref<128x512xbf16, #tpu.memory_space<vmem>>, vector<128x512xbf16>
    %cst_181 = arith.constant dense<0.000000e+00> : vector<16x512xf32>
    %279 = tpu.matmul %277, %278, %cst_181 {dimension_numbers = #tpu.dot_dimension_numbers<[1], [0], [0], [1], [0, 0, 1, 1], [], []>} : vector<16x128xbf16>, vector<128x512xbf16>, vector<16x512xf32> -> vector<16x512xf32>
    %280 = arith.addf %275, %279 : vector<16x512xf32>
    %281 = vector.extract_strided_slice %280 {offsets = [0, 0], sizes = [16, 384], strides = [1, 1]} : vector<16x512xf32> to vector<16x384xf32>
    %cst_182 = arith.constant 5.000000e-01 : f32
    %282 = vector.broadcast %cst_182 : f32 to vector<16x384xf32>
    %283 = arith.mulf %282, %281 : vector<16x384xf32>
    %284 = math.tanh %283 : vector<16x384xf32>
    %cst_183 = arith.constant 5.000000e-01 : f32
    %285 = vector.broadcast %cst_183 : f32 to vector<16x384xf32>
    %286 = arith.mulf %285, %284 : vector<16x384xf32>
    %cst_184 = arith.constant 5.000000e-01 : f32
    %287 = vector.broadcast %cst_184 : f32 to vector<16x384xf32>
    %288 = arith.addf %286, %287 : vector<16x384xf32>
    %289 = vector.extract_strided_slice %288 {offsets = [0, 0], sizes = [16, 128], strides = [1, 1]} : vector<16x384xf32> to vector<16x128xf32>
    %290 = vector.extract_strided_slice %288 {offsets = [0, 128], sizes = [16, 128], strides = [1, 1]} : vector<16x384xf32> to vector<16x128xf32>
    %291 = vector.extract_strided_slice %288 {offsets = [0, 256], sizes = [16, 128], strides = [1, 1]} : vector<16x384xf32> to vector<16x128xf32>
    %292 = vector.extract_strided_slice %280 {offsets = [0, 384], sizes = [16, 128], strides = [1, 1]} : vector<16x512xf32> to vector<16x128xf32>
    %293 = math.tanh %292 : vector<16x128xf32>
    %c0_185 = arith.constant 0 : index
    %c0_186 = arith.constant 0 : index
    %294 = vector.load %arg11[%c0_185, %c0_186] : memref<16x128xf32, #tpu.memory_space<vmem>>, vector<16x128xf32>
    %295 = arith.mulf %290, %294 : vector<16x128xf32>
    %296 = arith.mulf %289, %293 : vector<16x128xf32>
    %297 = arith.addf %295, %296 : vector<16x128xf32>
    %298 = math.tanh %297 : vector<16x128xf32>
    %299 = arith.mulf %291, %298 : vector<16x128xf32>
    %c0_187 = arith.constant 0 : index
    %c0_188 = arith.constant 0 : index
    %300 = vector.load %arg11[%c0_187, %c0_188] : memref<16x128xf32, #tpu.memory_space<vmem>>, vector<16x128xf32>
    tpu.vector_store %arg11[%c0_187, %c0_188], %297 {strides = array<i32>} : memref<16x128xf32, #tpu.memory_space<vmem>>, vector<16x128xf32>,
    %c0_189 = arith.constant 0 : index
    %c0_190 = arith.constant 0 : index
    %301 = vector.load %arg10[%c0_189, %c0_190] : memref<16x128xf32, #tpu.memory_space<vmem>>, vector<16x128xf32>
    tpu.vector_store %arg10[%c0_189, %c0_190], %299 {strides = array<i32>} : memref<16x128xf32, #tpu.memory_space<vmem>>, vector<16x128xf32>,
    %c7_i32_191 = arith.constant 7 : i32
    %302 = arith.index_cast %c7_i32_191 : i32 to index
    %c0_192 = arith.constant 0 : index
    %c0_193 = arith.constant 0 : index
    %303 = vector.load %arg9[%302, %c0_192, %c0_193] : memref<8x16x512xf32, #tpu.memory_space<vmem>>, vector<1x16x512xf32>
    %304 = vector.shape_cast %303 : vector<1x16x512xf32> to vector<16x512xf32>
    %c0_194 = arith.constant 0 : index
    %c0_195 = arith.constant 0 : index
    %305 = vector.load %arg10[%c0_194, %c0_195] : memref<16x128xf32, #tpu.memory_space<vmem>>, vector<16x128xf32>
    %306 = arith.truncf %305 : vector<16x128xf32> to vector<16x128xbf16>
    %c0_196 = arith.constant 0 : index
    %c0_197 = arith.constant 0 : index
    %307 = vector.load %arg4[%c0_196, %c0_197] : memref<128x512xbf16, #tpu.memory_space<vmem>>, vector<128x512xbf16>
    %cst_198 = arith.constant dense<0.000000e+00> : vector<16x512xf32>
    %308 = tpu.matmul %306, %307, %cst_198 {dimension_numbers = #tpu.dot_dimension_numbers<[1], [0], [0], [1], [0, 0, 1, 1], [], []>} : vector<16x128xbf16>, vector<128x512xbf16>, vector<16x512xf32> -> vector<16x512xf32>
    %309 = arith.addf %304, %308 : vector<16x512xf32>
    %310 = vector.extract_strided_slice %309 {offsets = [0, 0], sizes = [16, 384], strides = [1, 1]} : vector<16x512xf32> to vector<16x384xf32>
    %cst_199 = arith.constant 5.000000e-01 : f32
    %311 = vector.broadcast %cst_199 : f32 to vector<16x384xf32>
    %312 = arith.mulf %311, %310 : vector<16x384xf32>
    %313 = math.tanh %312 : vector<16x384xf32>
    %cst_200 = arith.constant 5.000000e-01 : f32
    %314 = vector.broadcast %cst_200 : f32 to vector<16x384xf32>
    %315 = arith.mulf %314, %313 : vector<16x384xf32>
    %cst_201 = arith.constant 5.000000e-01 : f32
    %316 = vector.broadcast %cst_201 : f32 to vector<16x384xf32>
    %317 = arith.addf %315, %316 : vector<16x384xf32>
    %318 = vector.extract_strided_slice %317 {offsets = [0, 0], sizes = [16, 128], strides = [1, 1]} : vector<16x384xf32> to vector<16x128xf32>
    %319 = vector.extract_strided_slice %317 {offsets = [0, 128], sizes = [16, 128], strides = [1, 1]} : vector<16x384xf32> to vector<16x128xf32>
    %320 = vector.extract_strided_slice %317 {offsets = [0, 256], sizes = [16, 128], strides = [1, 1]} : vector<16x384xf32> to vector<16x128xf32>
    %321 = vector.extract_strided_slice %309 {offsets = [0, 384], sizes = [16, 128], strides = [1, 1]} : vector<16x512xf32> to vector<16x128xf32>
    %322 = math.tanh %321 : vector<16x128xf32>
    %c0_202 = arith.constant 0 : index
    %c0_203 = arith.constant 0 : index
    %323 = vector.load %arg11[%c0_202, %c0_203] : memref<16x128xf32, #tpu.memory_space<vmem>>, vector<16x128xf32>
    %324 = arith.mulf %319, %323 : vector<16x128xf32>
    %325 = arith.mulf %318, %322 : vector<16x128xf32>
    %326 = arith.addf %324, %325 : vector<16x128xf32>
    %327 = math.tanh %326 : vector<16x128xf32>
    %328 = arith.mulf %320, %327 : vector<16x128xf32>
    %c0_204 = arith.constant 0 : index
    %c0_205 = arith.constant 0 : index
    %329 = vector.load %arg11[%c0_204, %c0_205] : memref<16x128xf32, #tpu.memory_space<vmem>>, vector<16x128xf32>
    tpu.vector_store %arg11[%c0_204, %c0_205], %326 {strides = array<i32>} : memref<16x128xf32, #tpu.memory_space<vmem>>, vector<16x128xf32>,
    %c0_206 = arith.constant 0 : index
    %c0_207 = arith.constant 0 : index
    %330 = vector.load %arg10[%c0_206, %c0_207] : memref<16x128xf32, #tpu.memory_space<vmem>>, vector<16x128xf32>
    tpu.vector_store %arg10[%c0_206, %c0_207], %328 {strides = array<i32>} : memref<16x128xf32, #tpu.memory_space<vmem>>, vector<16x128xf32>,
    %c8_i32_208 = arith.constant 8 : i32
    %c0_i32_209 = arith.constant 0 : i32
    %331 = arith.cmpi eq, %arg1, %c0_i32_209 : i32
    %332 = arith.extui %331 : i1 to i32
    %c0_i32_210 = arith.constant 0 : i32
    %333 = arith.cmpi ne, %332, %c0_i32_210 : i32
    scf.if %333 {
      %c0_211 = arith.constant 0 : index
      %c0_212 = arith.constant 0 : index
      %334 = vector.load %arg6[%c0_211, %c0_212] : memref<8x128xf32, #tpu.memory_space<vmem>>, vector<8x128xf32>
      %c0_213 = arith.constant 0 : index
      %c0_214 = arith.constant 0 : index
      %335 = vector.load %arg10[%c0_213, %c0_214] : memref<16x128xf32, #tpu.memory_space<vmem>>, vector<16x128xf32>
      %336 = tpu.transpose %335, [1, 0] : vector<16x128xf32> -> vector<128x16xf32>
      %cst_215 = arith.constant dense<0.000000e+00> : vector<8x16xf32>
      %337 = tpu.matmul %334, %336, %cst_215 {dimension_numbers = #tpu.dot_dimension_numbers<[1], [0], [0], [1], [0, 0, 1, 1], [], []>} : vector<8x128xf32>, vector<128x16xf32>, vector<8x16xf32> -> vector<8x16xf32>
      %338 = vector.extract_strided_slice %337 {offsets = [0, 0], sizes = [1, 16], strides = [1, 1]} : vector<8x16xf32> to vector<1x16xf32>
      %c0_216 = arith.constant 0 : index
      %c0_217 = arith.constant 0 : index
      %339 = vector.load %arg7[%c0_216, %c0_217] : memref<1x1xf32, #tpu.memory_space<vmem>>, vector<1x1xf32>
      %340 = vector.broadcast %339 : vector<1x1xf32> to vector<1x16xf32>
      %341 = arith.addf %338, %340 : vector<1x16xf32>
      %cst_218 = arith.constant 5.000000e-01 : f32
      %342 = vector.broadcast %cst_218 : f32 to vector<1x16xf32>
      %343 = arith.mulf %342, %341 : vector<1x16xf32>
      %344 = math.tanh %343 : vector<1x16xf32>
      %cst_219 = arith.constant 5.000000e-01 : f32
      %345 = vector.broadcast %cst_219 : f32 to vector<1x16xf32>
      %346 = arith.mulf %345, %344 : vector<1x16xf32>
      %cst_220 = arith.constant 5.000000e-01 : f32
      %347 = vector.broadcast %cst_220 : f32 to vector<1x16xf32>
      %348 = arith.addf %346, %347 : vector<1x16xf32>
      %c0_221 = arith.constant 0 : index
      %c0_222 = arith.constant 0 : index
      %349 = vector.load %arg8[%c0_221, %c0_222] : memref<1x16xf32, #tpu.memory_space<vmem>>, vector<1x16xf32>
      tpu.vector_store %arg8[%c0_221, %c0_222], %348 {strides = array<i32>} : memref<1x16xf32, #tpu.memory_space<vmem>>, vector<1x16xf32>,
    } else {
    }
    return
  }
  func.func @transform_0(%arg0: i32, %arg1: i32) -> (i32, i32, i32) {
    %c0_i32 = arith.constant 0 : i32
    %c0_i32_0 = arith.constant 0 : i32
    return %arg1, %arg0, %c0_i32 : i32, i32, i32
  }
  func.func @transform_1(%arg0: i32, %arg1: i32) -> (i32, i32) {
    %c0_i32 = arith.constant 0 : i32
    %c0_i32_0 = arith.constant 0 : i32
    %c0_i32_1 = arith.constant 0 : i32
    return %c0_i32, %c0_i32_0 : i32, i32
  }
  func.func @transform_2(%arg0: i32, %arg1: i32) -> (i32, i32) {
    %c0_i32 = arith.constant 0 : i32
    %c0_i32_0 = arith.constant 0 : i32
    %c0_i32_1 = arith.constant 0 : i32
    return %c0_i32, %c0_i32_0 : i32, i32
  }
  func.func @transform_3(%arg0: i32, %arg1: i32) -> (i32, i32) {
    %c0_i32 = arith.constant 0 : i32
    %c0_i32_0 = arith.constant 0 : i32
    %c0_i32_1 = arith.constant 0 : i32
    return %c0_i32, %c0_i32_0 : i32, i32
  }
  func.func @transform_4(%arg0: i32, %arg1: i32) -> (i32, i32) {
    %c0_i32 = arith.constant 0 : i32
    %c0_i32_0 = arith.constant 0 : i32
    %c0_i32_1 = arith.constant 0 : i32
    return %c0_i32, %c0_i32_0 : i32, i32
  }
  func.func @transform_5(%arg0: i32, %arg1: i32) -> (i32, i32) {
    %c0_i32 = arith.constant 0 : i32
    %c0_i32_0 = arith.constant 0 : i32
    %c0_i32_1 = arith.constant 0 : i32
    return %c0_i32, %c0_i32_0 : i32, i32
  }
  func.func @transform_6(%arg0: i32, %arg1: i32) -> (i32, i32) {
    %c0_i32 = arith.constant 0 : i32
    %c0_i32_0 = arith.constant 0 : i32
    return %c0_i32, %arg0 : i32, i32
  }
}

</mosaic_0001>

<bundles_post_ra>
// kernel: tpu_custom_call.1
= control target key start
LH: loop header
LB: loop body
LE: loop exit
PB: predicated region body
PF: predicated region fallthrough
CT: control target
= control target key end

     0   :  { %s5725_s0 = inlined_call_operand.hbm [shape: bf16[8,16,16], index: 0, kind: input, shape index: {}]   ;;  %s5726_s1 = inlined_call_operand.hbm [shape: bf16[16,512], index: 1, kind: input, shape index: {}]   ;;  %s5727_s2 = inlined_call_operand.hbm [shape: bf16[128,512], index: 2, kind: input, shape index: {}]   ;;  %s5728_s3 = inlined_call_operand.hbm [shape: f32[1,512], index: 3, kind: input, shape index: {}]   ;;  %s5729_s4 = inlined_call_operand.vmem [shape: f32[8,128], index: 4, kind: input, shape index: {}]   ;;  %s5730_s5 = inlined_call_operand.<no memory space> [shape: f32[1,1], index: 5, kind: input, shape index: {}]   ;;  %s5731_s6 = inlined_call_operand.hbm [shape: f32[1,16], index: 6, kind: output, shape index: {}]  }
   0x1   :  { %v11_v0 = vstv %s5730_s5 }
   0x2   :  { %12 = vst [vmem:[#allocation5] sm:$0x1] %v11_v0 }
   0x3   :  { %13 = vsyncpa [#allocation7], 0 }
   0x4   :  { %14 = vsyncpa [#allocation10], 0 }
   0x5   :  { %15 = vsyncpa [#allocation13], 0 }
   0x6   :  { %16 = vsyncpa [#allocation8], 0  ;;  %s4893_s23 = smov [#allocation9]  }
   0x7   :  { %s34_s24 = sshll.u32 %s4893_s23, 4  ;;  %s35_s24 = int_to_ptr.vmem [resolvable:$true] %s34_s24 }
   0x8   :  { %s4793_s25 = scalar_lea.vmem %s35_s24, 512  ;;  %p4798_p1 = scmp.lt.s32.totalorder %s35_s24, %s35_s24 }
   0x9   :  { %p4794_p0 = scmp.ne.s32.totalorder %s35_s24, %s4793_s25  ;;  %p4799_p2 = scmp.lt.s32.totalorder %s4793_s25, %s4793_s25 }
   0xb   :  { %p4800_p3 = por %p4799_p2, %p4798_p1 }
   0xd   :  { %p4801_p4 = pnand %p4800_p3, %p4794_p0 }
   0xf   :  { %4804 = shalt.err (!%p4801_p4)
}
  0x10   :  { %s4894_s26 = smov 256   ;;  %s4895_s27 = smov 16  }
  0x11   :  { %40 = dma.hbm_to_vmem [thread:$0]  %s5726_s1, 512, %s35_s24, [#allocation10], %s4894_s26, %s4894_s26, %s4895_s27  }
  0x12   :  { %s4896_s29 = smov [#allocation6]  }
  0x13   :  { %s22_s30 = sshll.u32 %s4896_s29, 4  ;;  %s23_s30 = int_to_ptr.vmem [resolvable:$true] %s22_s30 }
  0x14   :  { %s4813_s7 = scalar_lea.vmem %s23_s30, 1024  ;;  %p4818_p6 = scmp.lt.s32.totalorder %s23_s30, %s23_s30 }
  0x15   :  { %p4814_p5 = scmp.ne.s32.totalorder %s23_s30, %s4813_s7  ;;  %p4819_p7 = scmp.lt.s32.totalorder %s4813_s7, %s4813_s7 }
  0x17   :  { %p4820_p8 = por %p4819_p7, %p4818_p6 }
  0x19   :  { %p4821_p9 = pnand %p4820_p8, %p4814_p5 }
  0x1b   :  { %4824 = shalt.err (!%p4821_p9)
}
  0x1c   :  { %s4897_s8 = smov 64   ;;  %s4898_s9 = smov 4  }
  0x1d   :  { %28 = dma.hbm_to_vmem [thread:$0]  %s5725_s0, 1024, %s23_s30, [#allocation7], %s4897_s8, %s4897_s8, %s4898_s9  }
  0x1e   :  { %s4899_s12 = smov [#allocation11]   ;;  %s4900_s14 = smov [#allocation12]  }
  0x1f   :  { %s46_s13 = sshll.u32 %s4899_s12, 4  ;;  %s59_s1 = sshll.u32 %s4900_s14, 4  ;;  %s47_s13 = int_to_ptr.vmem [resolvable:$true] %s46_s13  ;;  %s60_s1 = int_to_ptr.vmem [resolvable:$true] %s59_s1 }
  0x20   :  { %s4833_s15 = scalar_lea.vmem %s47_s13, 4096  ;;  %p4838_p11 = scmp.lt.s32.totalorder %s47_s13, %s47_s13 }
  0x21   :  { %p4834_p10 = scmp.ne.s32.totalorder %s47_s13, %s4833_s15  ;;  %p4839_p12 = scmp.lt.s32.totalorder %s4833_s15, %s4833_s15 }
  0x23   :  { %p4840_p13 = por %p4839_p12, %p4838_p11 }
  0x25   :  { %p4841_p0 = pnand %p4840_p13, %p4834_p10 }
  0x27   :  { %4844 = shalt.err (!%p4841_p0)
}
  0x28   :  { %52 = dma.hbm_to_vmem [thread:$0]  %s5727_s2, 4096, %s47_s13, [#allocation10], %s4894_s26, %s4894_s26, %s4895_s27  }
  0x29   :  { %s4853_s0 = scalar_lea.vmem %s60_s1, 64  ;;  %p4858_p2 = scmp.lt.s32.totalorder %s60_s1, %s60_s1 }
  0x2a   :  { %p4854_p1 = scmp.ne.s32.totalorder %s60_s1, %s4853_s0  ;;  %p4859_p3 = scmp.lt.s32.totalorder %s4853_s0, %s4853_s0 }
  0x2c   :  { %p4860_p4 = por %p4859_p3, %p4858_p2 }
  0x2e   :  { %p4861_p5 = pnand %p4860_p4, %p4854_p1 }
  0x30   :  { %4864 = shalt.err (!%p4861_p5)
}
  0x31   :  { %62 = dma.hbm_to_vmem [thread:$0]  %s5728_s3, 64, %s60_s1, [#allocation13]  }
  0x32   :  { %4885 = dma.done.wait [#allocation7], 1024  }
  0x33   :  { %4886 = vsyncadd [#allocation7], 4294966272 }
  0x34   :  { %4887 = dma.done.wait [#allocation10], 4608  }
  0x35   :  { %4888 = vsyncadd [#allocation10], 4294962688 }
  0x36   :  { %4889 = dma.done.wait [#allocation13], 64  }
  0x37   :  { %4890 = vsyncadd [#allocation13], 4294967232  ;;  %v5732_v1 = vmov 0   ;;  %v4965_v2 = vld [vmem:[#allocation9 + $0x4] ss:$16 sps:$4 sm:$0xff]   ;;  %vm141_vm0 = vcmask 130048   ;;  %v96_v47 = vlaneseq }
  0x38   :  { %177 = vmatprep.mubr.bf16.mxu0 %v5732_v1  ;;  %220 = vmatprep.mubr.bf16.mxu1 %v5732_v1  ;;  %v4967_v3 = vld [vmem:[#allocation9 + $0xc] ss:$16 sps:$4 sm:$0xff]   ;;  %v4970_v4 = vld [vmem:[#allocation9] ss:$16 sps:$4 sm:$0xff]   ;;  %v4972_v5 = vld [vmem:[#allocation9 + $0x8] ss:$16 sps:$4 sm:$0xff]  }
  0x39   :  { %4460 = vset.pattern.permute.xlu0 %v5732_v1  ;;  %159 = vmatprep.subr.bf16.mxu0 %v4965_v2  ;;  %v4467_v6 = vld [vmem:[#allocation6] sm:$0xff]   ;;  %v4468_v7 = vld [vmem:[#allocation6 + $0x8] sm:$0xff]   ;;  %v4469_v8 = vld [vmem:[#allocation6 + $0x10] sm:$0xff]   ;;  %v4902_v46 = vmov 0.0|0.0   ;;  %v5173_v50 = vshrl.u32 %v96_v47, 7  ;;  %vm4904_vm1 = vmmov 0  }
  0x3a   :  { %202 = vmatprep.subr.bf16.mxu1 %v4967_v3  ;;  %160 = vmatpush1.bf16.msra.mxu0 %v4970_v4  ;;  %v4470_v9 = vld [vmem:[#allocation6 + $0x18] sm:$0xff]   ;;  %v4471_v10 = vld [vmem:[#allocation6 + $0x20] sm:$0xff]   ;;  %v4472_v11 = vld [vmem:[#allocation6 + $0x28] sm:$0xff]   ;;  %s4905_s20 = smov [#allocation14]   ;;  %vm4106_vm2 = vcmask 122880  }
  0x3b   :  { %203 = vmatpush1.bf16.msra.mxu1 %v4972_v5  ;;  %310 = vmatprep.subr.bf16.mxu0 %v4965_v2  ;;  %v4473_v12 = vld [vmem:[#allocation6 + $0x30] sm:$0xff]   ;;  %v5029_v14 = vld [vmem:[#allocation11 + $0xec] ss:$16 sps:$4 sm:$0xff]   ;;  %v5041_v17 = vld [vmem:[#allocation11 + $0xe8] ss:$16 sps:$4 sm:$0xff]   ;;  %v5180_v53 = vsub.s32 2, %v5173_v50 }
  0x3c   :  { %353 = vmatprep.subr.bf16.mxu1 %v4967_v3  ;;  %v5027_v13 = vld [vmem:[#allocation11 + $0xe4] ss:$16 sps:$4 sm:$0xff]   ;;  %v4480_v15 = vld [vmem:[#allocation6 + $0x38] sm:$0xff]   ;;  %v5039_v16 = vld [vmem:[#allocation11 + $0xe0] ss:$16 sps:$4 sm:$0xff]   ;;  %v5189_v57 = vsub.s32 1, %v5173_v50 }
  0x3d   :  { %4130 = vmatmul.mubr.msk.bf16.vlgmr.msra.gmra.mxu0 %vm141_vm0, %v4467_v6  ;;  %v5043_v18 = vld [vmem:[#allocation11 + $0xc4] ss:$16 sps:$4 sm:$0xff]   ;;  %v5045_v19 = vld [vmem:[#allocation11 + $0xcc] ss:$16 sps:$4 sm:$0xff]   ;;  %v5051_v20 = vld [vmem:[#allocation11 + $0xc0] ss:$16 sps:$4 sm:$0xff]  }
  0x3e   :  { %4131 = vmatmul.mubr.msk.bf16.vlgmr.msra.gmra.mxu1 %vm141_vm0, %v4467_v6  ;;  %311 = vmatpush1.bf16.msra.mxu0 %v4970_v4  ;;  %v5053_v21 = vld [vmem:[#allocation11 + $0xc8] ss:$16 sps:$4 sm:$0xff]   ;;  %v5057_v22 = vld [vmem:[#allocation11 + $0xa4] ss:$16 sps:$4 sm:$0xff]   ;;  %v5059_v23 = vld [vmem:[#allocation11 + $0xac] ss:$16 sps:$4 sm:$0xff]  }
  0x3f   :  { %354 = vmatpush1.bf16.msra.mxu1 %v4972_v5  ;;  %328 = vmatprep.mubr.bf16.mxu0 %v5732_v1  ;;  %v5065_v24 = vld [vmem:[#allocation11 + $0xa0] ss:$16 sps:$4 sm:$0xff]   ;;  %v5067_v25 = vld [vmem:[#allocation11 + $0xa8] ss:$16 sps:$4 sm:$0xff]   ;;  %v5071_v26 = vld [vmem:[#allocation11 + $0x84] ss:$16 sps:$4 sm:$0xff]  }
  0x40   :  { %371 = vmatprep.mubr.bf16.mxu1 %v5732_v1  ;;  %462 = vmatprep.subr.bf16.mxu0 %v4965_v2  ;;  %v5073_v27 = vld [vmem:[#allocation11 + $0x8c] ss:$16 sps:$4 sm:$0xff]   ;;  %v5077_v28 = vld [vmem:[#allocation11 + $0x80] ss:$16 sps:$4 sm:$0xff]   ;;  %v5079_v29 = vld [vmem:[#allocation11 + $0x88] ss:$16 sps:$4 sm:$0xff]  }
  0x41   :  { %505 = vmatprep.subr.bf16.mxu1 %v4967_v3  ;;  %v5083_v30 = vld [vmem:[#allocation11 + $0x64] ss:$16 sps:$4 sm:$0xff]   ;;  %v5085_v31 = vld [vmem:[#allocation11 + $0x6c] ss:$16 sps:$4 sm:$0xff]   ;;  %v5089_v32 = vld [vmem:[#allocation11 + $0x60] ss:$16 sps:$4 sm:$0xff]  }
  0x42   :  { %v5091_v33 = vld [vmem:[#allocation11 + $0x68] ss:$16 sps:$4 sm:$0xff]   ;;  %v5095_v34 = vld [vmem:[#allocation11 + $0x44] ss:$16 sps:$4 sm:$0xff]   ;;  %v5097_v35 = vld [vmem:[#allocation11 + $0x4c] ss:$16 sps:$4 sm:$0xff]  }
  0x43   :  { %v5101_v36 = vld [vmem:[#allocation11 + $0x40] ss:$16 sps:$4 sm:$0xff]   ;;  %v5103_v37 = vld [vmem:[#allocation11 + $0x48] ss:$16 sps:$4 sm:$0xff]   ;;  %v5107_v38 = vld [vmem:[#allocation11 + $0x24] ss:$16 sps:$4 sm:$0xff]  }
  0x44   :  { %v5109_v39 = vld [vmem:[#allocation11 + $0x2c] ss:$16 sps:$4 sm:$0xff]   ;;  %v5113_v40 = vld [vmem:[#allocation11 + $0x20] ss:$16 sps:$4 sm:$0xff]   ;;  %v5115_v41 = vld [vmem:[#allocation11 + $0x28] ss:$16 sps:$4 sm:$0xff]  }
  0x45   :  { %4137 = vmatmul.mubr.msk.bf16.vlgmr.msra.gmra.mxu0 %vm141_vm0, %v4468_v7  ;;  %v5119_v42 = vld [vmem:[#allocation11 + $0x4] ss:$16 sps:$4 sm:$0xff]   ;;  %v5121_v43 = vld [vmem:[#allocation11 + $0xc] ss:$16 sps:$4 sm:$0xff]   ;;  %v5125_v44 = vld [vmem:[#allocation11] ss:$16 sps:$4 sm:$0xff]  }
  0x46   :  { %4138 = vmatmul.mubr.msk.bf16.vlgmr.msra.gmra.mxu1 %vm141_vm0, %v4468_v7  ;;  %463 = vmatpush1.bf16.msra.mxu0 %v4970_v4  ;;  %v5127_v45 = vld [vmem:[#allocation11 + $0x8] ss:$16 sps:$4 sm:$0xff]   ;;  %v5186_v56 = vld [vmem:[#allocation12] sm:$0xf]  ;;  %v5192_v58 = vsub.s32 3, %v5173_v50  ;;  %s4114_s21 = sshll.u32 %s4905_s20, 4  ;;  %s4115_s21 = int_to_ptr.vmem [resolvable:$true] %s4114_s21 }
  0x47   :  { %506 = vmatpush1.bf16.msra.mxu1 %v4972_v5  ;;  %480 = vmatprep.mubr.bf16.mxu0 %v5732_v1  ;;  %v259_v59 = vrot.slane %v5186_v56, %v5180_v53  ;;  %v255_v62 = vrot.slane %v5186_v56, %v5189_v57  ;;  %s4865_s22 = scalar_lea.vmem %s4115_s21, 16  ;;  %p4870_p7 = scmp.lt.s32.totalorder %s4115_s21, %s4115_s21 }
  0x48   :  { %523 = vmatprep.mubr.bf16.mxu1 %v5732_v1  ;;  %614 = vmatprep.subr.bf16.mxu0 %v4965_v2  ;;  %v263_v63 = vrot.slane %v5186_v56, %v5192_v58  ;;  %p4866_p6 = scmp.ne.s32.totalorder %s4115_s21, %s4865_s22 }
  0x49   :  { %657 = vmatprep.subr.bf16.mxu1 %v4967_v3 }
  0x4d   :  { %4144 = vmatmul.mubr.msk.bf16.vlgmr.msra.gmra.mxu0 %vm141_vm0, %v4469_v8 }
  0x4e   :  { %4145 = vmatmul.mubr.msk.bf16.vlgmr.msra.gmra.mxu1 %vm141_vm0, %v4469_v8  ;;  %615 = vmatpush1.bf16.msra.mxu0 %v4970_v4 }
  0x4f   :  { %658 = vmatpush1.bf16.msra.mxu1 %v4972_v5  ;;  %632 = vmatprep.mubr.bf16.mxu0 %v5732_v1 }
  0x50   :  { %675 = vmatprep.mubr.bf16.mxu1 %v5732_v1  ;;  %766 = vmatprep.subr.bf16.mxu0 %v4965_v2 }
  0x51   :  { %809 = vmatprep.subr.bf16.mxu1 %v4967_v3 }
  0x55   :  { %4151 = vmatmul.mubr.msk.bf16.vlgmr.msra.gmra.mxu0 %vm141_vm0, %v4470_v9 }
  0x56   :  { %4152 = vmatmul.mubr.msk.bf16.vlgmr.msra.gmra.mxu1 %vm141_vm0, %v4470_v9  ;;  %767 = vmatpush1.bf16.msra.mxu0 %v4970_v4 }
  0x57   :  { %810 = vmatpush1.bf16.msra.mxu1 %v4972_v5  ;;  %784 = vmatprep.mubr.bf16.mxu0 %v5732_v1 }
  0x58   :  { %827 = vmatprep.mubr.bf16.mxu1 %v5732_v1  ;;  %918 = vmatprep.subr.bf16.mxu0 %v4965_v2 }
  0x59   :  { %961 = vmatprep.subr.bf16.mxu1 %v4967_v3 }
  0x5d   :  { %4158 = vmatmul.mubr.msk.bf16.vlgmr.msra.gmra.mxu0 %vm141_vm0, %v4471_v10 }
  0x5e   :  { %4159 = vmatmul.mubr.msk.bf16.vlgmr.msra.gmra.mxu1 %vm141_vm0, %v4471_v10  ;;  %919 = vmatpush1.bf16.msra.mxu0 %v4970_v4  ;;  %v5214_v10 = vld [vmem:[#allocation12] sm:$0xf] }
  0x5f   :  { %962 = vmatpush1.bf16.msra.mxu1 %v4972_v5  ;;  %936 = vmatprep.mubr.bf16.mxu0 %v5732_v1  ;;  %5739 = vst [vmem:[#allocation22_spill] sm:$0xff] %v5214_v10  ;;  %v407_v47 = vrot.slane %v5214_v10, %v5189_v57 }
  0x60   :  { %979 = vmatprep.mubr.bf16.mxu1 %v5732_v1  ;;  %1070 = vmatprep.subr.bf16.mxu0 %v4965_v2 }
  0x61   :  { %1113 = vmatprep.subr.bf16.mxu1 %v4967_v3 }
  0x65   :  { %4165 = vmatmul.mubr.msk.bf16.vlgmr.msra.gmra.mxu0 %vm141_vm0, %v4472_v11 }
  0x66   :  { %4166 = vmatmul.mubr.msk.bf16.vlgmr.msra.gmra.mxu1 %vm141_vm0, %v4472_v11  ;;  %1071 = vmatpush1.bf16.msra.mxu0 %v4970_v4 }
  0x67   :  { %1114 = vmatpush1.bf16.msra.mxu1 %v4972_v5  ;;  %1088 = vmatprep.mubr.bf16.mxu0 %v5732_v1 }
  0x68   :  { %1131 = vmatprep.mubr.bf16.mxu1 %v5732_v1  ;;  %1222 = vmatprep.subr.bf16.mxu0 %v4965_v2 }
  0x69   :  { %1265 = vmatprep.subr.bf16.mxu1 %v4967_v3 }
  0x6d   :  { %4172 = vmatmul.mubr.msk.bf16.vlgmr.msra.gmra.mxu0 %vm141_vm0, %v4473_v12 }
  0x6e   :  { %4173 = vmatmul.mubr.msk.bf16.vlgmr.msra.gmra.mxu1 %vm141_vm0, %v4473_v12  ;;  %1223 = vmatpush1.bf16.msra.mxu0 %v4970_v4  ;;  %v411_v12 = vrot.slane %v5214_v10, %v5180_v53 }
  0x6f   :  { %1266 = vmatpush1.bf16.msra.mxu1 %v4972_v5  ;;  %1240 = vmatprep.mubr.bf16.mxu0 %v5732_v1 }
  0x70   :  { %1283 = vmatprep.mubr.bf16.mxu1 %v5732_v1  ;;  %1506 = vmatprep.subr.bf16.mxu0 %v5027_v13 }
  0x71   :  { %1549 = vmatprep.subr.bf16.mxu1 %v5029_v14 }
  0x75   :  { %4179 = vmatmul.mubr.msk.bf16.vlgmr.msra.gmra.mxu0 %vm141_vm0, %v4480_v15 }
  0x76   :  { %4180 = vmatmul.mubr.msk.bf16.vlgmr.msra.gmra.mxu1 %vm141_vm0, %v4480_v15  ;;  %1507 = vmatpush1.bf16.msra.mxu0 %v5039_v16 }
  0x77   :  { %1550 = vmatpush1.bf16.msra.mxu1 %v5041_v17  ;;  %1508 = vmatprep.subr.bf16.mxu0 %v5043_v18 }
  0x78   :  { %1551 = vmatprep.subr.bf16.mxu1 %v5045_v19  ;;  %1538 = vmatprep.mubr.bf16.mxu0 %v5732_v1 }
  0x79   :  { %1581 = vmatprep.mubr.bf16.mxu1 %v5732_v1 }
  0x7a   :  { %1509 = vmatpush1.bf16.msra.mxu0 %v5051_v20 }
  0x7b   :  { %1552 = vmatpush1.bf16.msra.mxu1 %v5053_v21  ;;  %1510 = vmatprep.subr.bf16.mxu0 %v5057_v22 }
  0x7c   :  { %1553 = vmatprep.subr.bf16.mxu1 %v5059_v23 }
  0x7e   :  { %1511 = vmatpush1.bf16.msra.mxu0 %v5065_v24 }
  0x7f   :  { %1554 = vmatpush1.bf16.msra.mxu1 %v5067_v25  ;;  %1512 = vmatprep.subr.bf16.mxu0 %v5071_v26 }
  0x80   :  { %1555 = vmatprep.subr.bf16.mxu1 %v5073_v27 }
  0x82   :  { %1513 = vmatpush1.bf16.msra.mxu0 %v5077_v28 }
  0x83   :  { %1556 = vmatpush1.bf16.msra.mxu1 %v5079_v29  ;;  %1514 = vmatprep.subr.bf16.mxu0 %v5083_v30 }
  0x84   :  { %1557 = vmatprep.subr.bf16.mxu1 %v5085_v31 }
  0x86   :  { %1515 = vmatpush1.bf16.msra.mxu0 %v5089_v32 }
  0x87   :  { %1558 = vmatpush1.bf16.msra.mxu1 %v5091_v33  ;;  %1516 = vmatprep.subr.bf16.mxu0 %v5095_v34 }
  0x88   :  { %1559 = vmatprep.subr.bf16.mxu1 %v5097_v35 }
  0x8a   :  { %1517 = vmatpush1.bf16.msra.mxu0 %v5101_v36 }
  0x8b   :  { %1560 = vmatpush1.bf16.msra.mxu1 %v5103_v37  ;;  %1518 = vmatprep.subr.bf16.mxu0 %v5107_v38 }
  0x8c   :  { %1561 = vmatprep.subr.bf16.mxu1 %v5109_v39 }
  0x8e   :  { %1519 = vmatpush1.bf16.msra.mxu0 %v5113_v40 }
  0x8f   :  { %1562 = vmatpush1.bf16.msra.mxu1 %v5115_v41  ;;  %1520 = vmatprep.subr.bf16.mxu0 %v5119_v42 }
  0x90   :  { %1563 = vmatprep.subr.bf16.mxu1 %v5121_v43 }
  0x92   :  { %1521 = vmatpush1.bf16.msra.mxu0 %v5125_v44 }
  0x93   :  { %1564 = vmatpush1.bf16.msra.mxu1 %v5127_v45  ;;  %1845 = vmatprep.subr.bf16.mxu0 %v5027_v13 }
  0x94   :  { %1888 = vmatprep.subr.bf16.mxu1 %v5029_v14 }
  0x95   :  { %1539 = vmatmul.mubr.bf16.vlgmr.msra.gmra.mxu0 %v4902_v46 }
  0x96   :  { %1582 = vmatmul.mubr.bf16.vlgmr.msra.gmra.mxu1 %v4902_v46  ;;  %1846 = vmatpush1.bf16.msra.mxu0 %v5039_v16 }
  0x97   :  { %1889 = vmatpush1.bf16.msra.mxu1 %v5041_v17  ;;  %1847 = vmatprep.subr.bf16.mxu0 %v5043_v18 }
  0x98   :  { %1890 = vmatprep.subr.bf16.mxu1 %v5045_v19  ;;  %1877 = vmatprep.mubr.bf16.mxu0 %v5732_v1 }
  0x99   :  { %1920 = vmatprep.mubr.bf16.mxu1 %v5732_v1 }
  0x9a   :  { %1848 = vmatpush1.bf16.msra.mxu0 %v5051_v20 }
  0x9b   :  { %1891 = vmatpush1.bf16.msra.mxu1 %v5053_v21  ;;  %1849 = vmatprep.subr.bf16.mxu0 %v5057_v22 }
  0x9c   :  { %1892 = vmatprep.subr.bf16.mxu1 %v5059_v23 }
  0x9e   :  { %1850 = vmatpush1.bf16.msra.mxu0 %v5065_v24 }
  0x9f   :  { %1893 = vmatpush1.bf16.msra.mxu1 %v5067_v25  ;;  %1851 = vmatprep.subr.bf16.mxu0 %v5071_v26 }
  0xa0   :  { %1894 = vmatprep.subr.bf16.mxu1 %v5073_v27 }
  0xa2   :  { %1852 = vmatpush1.bf16.msra.mxu0 %v5077_v28 }
  0xa3   :  { %1895 = vmatpush1.bf16.msra.mxu1 %v5079_v29  ;;  %1853 = vmatprep.subr.bf16.mxu0 %v5083_v30 }
  0xa4   :  { %1896 = vmatprep.subr.bf16.mxu1 %v5085_v31 }
  0xa6   :  { %1854 = vmatpush1.bf16.msra.mxu0 %v5089_v32 }
  0xa7   :  { %1897 = vmatpush1.bf16.msra.mxu1 %v5091_v33  ;;  %1855 = vmatprep.subr.bf16.mxu0 %v5095_v34 }
  0xa8   :  { %1898 = vmatprep.subr.bf16.mxu1 %v5097_v35 }
  0xaa   :  { %1856 = vmatpush1.bf16.msra.mxu0 %v5101_v36 }
  0xab   :  { %1899 = vmatpush1.bf16.msra.mxu1 %v5103_v37  ;;  %1857 = vmatprep.subr.bf16.mxu0 %v5107_v38 }
  0xac   :  { %1900 = vmatprep.subr.bf16.mxu1 %v5109_v39 }
  0xae   :  { %1858 = vmatpush1.bf16.msra.mxu0 %v5113_v40 }
  0xaf   :  { %1901 = vmatpush1.bf16.msra.mxu1 %v5115_v41  ;;  %1859 = vmatprep.subr.bf16.mxu0 %v5119_v42 }
  0xb0   :  { %1902 = vmatprep.subr.bf16.mxu1 %v5121_v43 }
  0xb2   :  { %1860 = vmatpush1.bf16.msra.mxu0 %v5125_v44 }
  0xb3   :  { %1903 = vmatpush1.bf16.msra.mxu1 %v5127_v45  ;;  %2184 = vmatprep.subr.bf16.mxu0 %v5027_v13 }
  0xb4   :  { %2227 = vmatprep.subr.bf16.mxu1 %v5029_v14 }
  0xfd   :  { %v5169_v48 = vpop.f32.mrf.mxu0 }
  0xfe   :  { %v5171_v49 = vpop.f32.mrf.mxu1 }
  0xff   :  { %v5175_v51 = vpop.f32.mrf.mxu0 }
 0x100   :  { %v5177_v52 = vpop.f32.mrf.mxu1 }
 0x101   :  { %v5182_v54 = vpop.f32.mrf.mxu0 }
 0x102   :  { %v5184_v55 = vpop.f32.mrf.mxu1 }
 0x103   :  { %v5196_v60 = vpop.f32.mrf.mxu0 }
 0x104   :  { %v5198_v61 = vpop.f32.mrf.mxu1 }
 0x105   :  { %v5204_v0 = vpop.f32.mrf.mxu0 }
 0x106   :  { %v373_v2 = vpop.f32.mrf.mxu1 }
 0x107   :  { %v5206_v3 = vadd.f32 %v373_v2, %v259_v59  ;;  %v332_v4 = vpop.f32.mrf.mxu0  ;;  %v415_v2 = vrot.slane %v5214_v10, %v5192_v58 }
 0x108   :  { %v375_v5 = vpop.f32.mrf.mxu1  ;;  %v5208_v6 = vadd.f32 %v332_v4, %v255_v62 }
 0x109   :  { %5736 = vst [vmem:[#allocation19_spill] sm:$0xff] %v5206_v3  ;;  %v5210_v7 = vadd.f32 %v375_v5, %v263_v63  ;;  %v5212_v8 = vpop.f32.mrf.mxu0 }
 0x10a   :  { %5737 = vst [vmem:[#allocation20_spill] sm:$0xff] %v5208_v6  ;;  %v377_v9 = vpop.f32.mrf.mxu1 }
 0x10b   :  { %5738 = vst [vmem:[#allocation21_spill] sm:$0xff] %v5210_v7  ;;  %v5216_v11 = vadd.f32 %v377_v9, %v259_v59  ;;  %v336_v13 = vpop.f32.mrf.mxu0 }
 0x10c   :  { %v379_v14 = vpop.f32.mrf.mxu1  ;;  %v5220_v15 = vadd.f32 %v336_v13, %v255_v62  ;;  %v5238_v13 = vld [vmem:[#allocation12] sm:$0xf] }
 0x10d   :  { %5740 = vst [vmem:[#allocation23_spill] sm:$0xff] %v5216_v11  ;;  %v5222_v46 = vadd.f32 %v379_v14, %v263_v63  ;;  %v5228_v4 = vpop.f32.mrf.mxu0  ;;  %5748 = vst [vmem:[#allocation31_spill] sm:$0xff] %v5238_v13  ;;  %v563_v10 = vrot.slane %v5238_v13, %v5180_v53 }
 0x10e   :  { %5741 = vst [vmem:[#allocation24_spill] sm:$0xff] %v5220_v15  ;;  %5743 = vst [vmem:[#allocation26_spill] sm:$0xff] %v5228_v4  ;;  %v525_v5 = vpop.f32.mrf.mxu1 }
 0x10f   :  { %5742 = vst [vmem:[#allocation25_spill] sm:$0xff] %v5222_v46  ;;  %v5230_v59 = vadd.f32 %v525_v5, %v411_v12  ;;  %v484_v9 = vpop.f32.mrf.mxu0 }
 0x110   :  { %v527_v1 = vpop.f32.mrf.mxu1  ;;  %v5232_v11 = vadd.f32 %v484_v9, %v407_v47  ;;  %v567_v9 = vrot.slane %v5238_v13, %v5192_v58 }
 0x111   :  { %5744 = vst [vmem:[#allocation27_spill] sm:$0xff] %v5230_v59  ;;  %v5234_v3 = vadd.f32 %v527_v1, %v415_v2  ;;  %v5236_v62 = vpop.f32.mrf.mxu0  ;;  %v559_v1 = vrot.slane %v5238_v13, %v5189_v57 }
 0x112   :  { %5745 = vst [vmem:[#allocation28_spill] sm:$0xff] %v5232_v11  ;;  %5747 = vst [vmem:[#allocation30_spill] sm:$0xff] %v5236_v62  ;;  %v529_v63 = vpop.f32.mrf.mxu1 }
 0x113   :  { %5746 = vst [vmem:[#allocation29_spill] sm:$0xff] %v5234_v3  ;;  %v5240_v14 = vadd.f32 %v529_v63, %v411_v12  ;;  %v488_v4 = vpop.f32.mrf.mxu0 }
 0x114   :  { %v531_v46 = vpop.f32.mrf.mxu1  ;;  %v5244_v5 = vadd.f32 %v488_v4, %v407_v47 }
 0x115   :  { %5749 = vst [vmem:[#allocation32_spill] sm:$0xff] %v5240_v14  ;;  %v5246_v59 = vadd.f32 %v531_v46, %v415_v2  ;;  %v5252_v3 = vpop.f32.mrf.mxu0  ;;  %v702_v2 = vld [vmem:[#allocation12] sm:$0xf] }
 0x116   :  { %5750 = vst [vmem:[#allocation33_spill] sm:$0xff] %v5244_v5  ;;  %5752 = vst [vmem:[#allocation35_spill] sm:$0xff] %v5252_v3  ;;  %v677_v11 = vpop.f32.mrf.mxu1 }
 0x117   :  { %5751 = vst [vmem:[#allocation34_spill] sm:$0xff] %v5246_v59  ;;  %v5254_v12 = vadd.f32 %v677_v11, %v563_v10  ;;  %v636_v63 = vpop.f32.mrf.mxu0  ;;  %v715_v59 = vrot.slane %v702_v2, %v5180_v53 }
 0x118   :  { %v679_v14 = vpop.f32.mrf.mxu1  ;;  %v5256_v62 = vadd.f32 %v636_v63, %v559_v1  ;;  %v719_v63 = vrot.slane %v702_v2, %v5192_v58 }
 0x119   :  { %5753 = vst [vmem:[#allocation36_spill] sm:$0xff] %v5254_v12  ;;  %v5258_v15 = vadd.f32 %v679_v14, %v567_v9  ;;  %v5260_v47 = vpop.f32.mrf.mxu0  ;;  %v711_v12 = vrot.slane %v702_v2, %v5189_v57 }
 0x11a   :  { %5754 = vst [vmem:[#allocation37_spill] sm:$0xff] %v5256_v62  ;;  %5756 = vst [vmem:[#allocation39_spill] sm:$0xff] %v5260_v47  ;;  %v681_v46 = vpop.f32.mrf.mxu1 }
 0x11b   :  { %5755 = vst [vmem:[#allocation38_spill] sm:$0xff] %v5258_v15  ;;  %v5262_v4 = vadd.f32 %v681_v46, %v563_v10  ;;  %v640_v13 = vpop.f32.mrf.mxu0 }
 0x11c   :  { %v683_v5 = vpop.f32.mrf.mxu1  ;;  %v5265_v3 = vadd.f32 %v640_v13, %v559_v1 }
 0x11d   :  { %5757 = vst [vmem:[#allocation40_spill] sm:$0xff] %v5262_v4  ;;  %v5267_v11 = vadd.f32 %v683_v5, %v567_v9  ;;  %v5271_v14 = vpop.f32.mrf.mxu0  ;;  %v854_v5 = vld [vmem:[#allocation12] sm:$0xf] }
 0x11e   :  { %5758 = vst [vmem:[#allocation41_spill] sm:$0xff] %v5265_v3  ;;  %5760 = vst [vmem:[#allocation43_spill] sm:$0xff] %v5271_v14  ;;  %v829_v15 = vpop.f32.mrf.mxu1  ;;  %v867_v9 = vrot.slane %v854_v5, %v5180_v53 }
 0x11f   :  { %5759 = vst [vmem:[#allocation42_spill] sm:$0xff] %v5267_v11  ;;  %v5273_v62 = vadd.f32 %v829_v15, %v715_v59  ;;  %v788_v47 = vpop.f32.mrf.mxu0 }
 0x120   :  { %v831_v10 = vpop.f32.mrf.mxu1  ;;  %v5275_v46 = vadd.f32 %v788_v47, %v711_v12  ;;  %v871_v47 = vrot.slane %v854_v5, %v5192_v58 }
 0x121   :  { %5761 = vst [vmem:[#allocation44_spill] sm:$0xff] %v5273_v62  ;;  %v5277_v4 = vadd.f32 %v831_v10, %v719_v63  ;;  %v5279_v7 = vpop.f32.mrf.mxu0  ;;  %v863_v62 = vrot.slane %v854_v5, %v5189_v57 }
 0x122   :  { %5762 = vst [vmem:[#allocation45_spill] sm:$0xff] %v5275_v46  ;;  %5764 = vst [vmem:[#allocation47_spill] sm:$0xff] %v5279_v7  ;;  %v833_v13 = vpop.f32.mrf.mxu1 }
 0x123   :  { %5763 = vst [vmem:[#allocation46_spill] sm:$0xff] %v5277_v4  ;;  %v5281_v1 = vadd.f32 %v833_v13, %v715_v59  ;;  %v792_v2 = vpop.f32.mrf.mxu0 }
 0x124   :  { %v835_v11 = vpop.f32.mrf.mxu1  ;;  %v5284_v14 = vadd.f32 %v792_v2, %v711_v12 }
 0x125   :  { %5765 = vst [vmem:[#allocation48_spill] sm:$0xff] %v5281_v1  ;;  %v5286_v15 = vadd.f32 %v835_v11, %v719_v63  ;;  %v5290_v10 = vpop.f32.mrf.mxu0  ;;  %v1006_v11 = vld [vmem:[#allocation12] sm:$0xf] }
 0x126   :  { %5766 = vst [vmem:[#allocation49_spill] sm:$0xff] %v5284_v14  ;;  %5768 = vst [vmem:[#allocation51_spill] sm:$0xff] %v5290_v10  ;;  %v981_v4 = vpop.f32.mrf.mxu1  ;;  %v1019_v2 = vrot.slane %v1006_v11, %v5180_v53 }
 0x127   :  { %5767 = vst [vmem:[#allocation50_spill] sm:$0xff] %v5286_v15  ;;  %v5292_v46 = vadd.f32 %v981_v4, %v867_v9  ;;  %v940_v7 = vpop.f32.mrf.mxu0 }
 0x128   :  { %v983_v59 = vpop.f32.mrf.mxu1  ;;  %v5294_v13 = vadd.f32 %v940_v7, %v863_v62  ;;  %v1023_v7 = vrot.slane %v1006_v11, %v5192_v58 }
 0x129   :  { %5769 = vst [vmem:[#allocation52_spill] sm:$0xff] %v5292_v46  ;;  %v5296_v1 = vadd.f32 %v983_v59, %v871_v47  ;;  %v5298_v3 = vpop.f32.mrf.mxu0  ;;  %v1015_v46 = vrot.slane %v1006_v11, %v5189_v57 }
 0x12a   :  { %5770 = vst [vmem:[#allocation53_spill] sm:$0xff] %v5294_v13  ;;  %5772 = vst [vmem:[#allocation55_spill] sm:$0xff] %v5298_v3  ;;  %v985_v12 = vpop.f32.mrf.mxu1 }
 0x12b   :  { %5771 = vst [vmem:[#allocation54_spill] sm:$0xff] %v5296_v1  ;;  %v5300_v63 = vadd.f32 %v985_v12, %v867_v9  ;;  %v944_v5 = vpop.f32.mrf.mxu0 }
 0x12c   :  { %v987_v15 = vpop.f32.mrf.mxu1  ;;  %v5303_v10 = vadd.f32 %v944_v5, %v863_v62 }
 0x12d   :  { %5773 = vst [vmem:[#allocation56_spill] sm:$0xff] %v5300_v63  ;;  %v5305_v4 = vadd.f32 %v987_v15, %v871_v47  ;;  %v5309_v59 = vpop.f32.mrf.mxu0  ;;  %v1158_v15 = vld [vmem:[#allocation12] sm:$0xf] }
 0x12e   :  { %5774 = vst [vmem:[#allocation57_spill] sm:$0xff] %v5303_v10  ;;  %5776 = vst [vmem:[#allocation59_spill] sm:$0xff] %v5309_v59  ;;  %v1133_v1 = vpop.f32.mrf.mxu1  ;;  %v1171_v5 = vrot.slane %v1158_v15, %v5180_v53 }
 0x12f   :  { %5775 = vst [vmem:[#allocation58_spill] sm:$0xff] %v5305_v4  ;;  %v5311_v13 = vadd.f32 %v1133_v1, %v1019_v2  ;;  %v1092_v3 = vpop.f32.mrf.mxu0 }
 0x130   :  { %v1135_v9 = vpop.f32.mrf.mxu1  ;;  %v5313_v12 = vadd.f32 %v1092_v3, %v1015_v46  ;;  %v1175_v3 = vrot.slane %v1158_v15, %v5192_v58 }
 0x131   :  { %5777 = vst [vmem:[#allocation60_spill] sm:$0xff] %v5311_v13  ;;  %v5315_v63 = vadd.f32 %v1135_v9, %v1023_v7  ;;  %v5317_v14 = vpop.f32.mrf.mxu0  ;;  %v1167_v13 = vrot.slane %v1158_v15, %v5189_v57 }
 0x132   :  { %5778 = vst [vmem:[#allocation61_spill] sm:$0xff] %v5313_v12  ;;  %5780 = vst [vmem:[#allocation63_spill] sm:$0xff] %v5317_v14  ;;  %v1137_v62 = vpop.f32.mrf.mxu1 }
 0x133   :  { %5779 = vst [vmem:[#allocation62_spill] sm:$0xff] %v5315_v63  ;;  %v5319_v47 = vadd.f32 %v1137_v62, %v1019_v2  ;;  %v1096_v11 = vpop.f32.mrf.mxu0 }
 0x134   :  { %v1139_v4 = vpop.f32.mrf.mxu1  ;;  %v5322_v59 = vadd.f32 %v1096_v11, %v1015_v46 }
 0x135   :  { %5781 = vst [vmem:[#allocation64_spill] sm:$0xff] %v5319_v47  ;;  %v5324_v1 = vadd.f32 %v1139_v4, %v1023_v7  ;;  %v5328_v9 = vpop.f32.mrf.mxu0 }
 0x136   :  { %5782 = vst [vmem:[#allocation65_spill] sm:$0xff] %v5322_v59  ;;  %5784 = vst [vmem:[#allocation67_spill] sm:$0xff] %v5328_v9  ;;  %v1285_v63 = vpop.f32.mrf.mxu1 }
 0x137   :  { %5783 = vst [vmem:[#allocation66_spill] sm:$0xff] %v5324_v1  ;;  %v5330_v12 = vadd.f32 %v1285_v63, %v1171_v5  ;;  %v1244_v14 = vpop.f32.mrf.mxu0  ;;  %v5345_v63 = vsub.s32 0, %v5173_v50 }
 0x138   :  { %v1287_v2 = vpop.f32.mrf.mxu1  ;;  %v5332_v62 = vadd.f32 %v1244_v14, %v1167_v13 }
 0x139   :  { %5785 = vst [vmem:[#allocation68_spill] sm:$0xff] %v5330_v12  ;;  %v5334_v47 = vadd.f32 %v1287_v2, %v1175_v3  ;;  %v5336_v10 = vpop.f32.mrf.mxu0  ;;  %v94_v12 = vld [vmem:[#allocation12] sm:$0xf] }
 0x13a   :  { %5786 = vst [vmem:[#allocation69_spill] sm:$0xff] %v5332_v62  ;;  %5788 = vst [vmem:[#allocation71_spill] sm:$0xff] %v5336_v10  ;;  %v1289_v46 = vpop.f32.mrf.mxu1  ;;  %v99_v14 = vrot.slane %v94_v12, %v5345_v63  ;;  %v103_v2 = vrot.slane %v94_v12, %v5189_v57 }
 0x13b   :  { %5787 = vst [vmem:[#allocation70_spill] sm:$0xff] %v5334_v47  ;;  %v5338_v4 = vadd.f32 %v1289_v46, %v1171_v5  ;;  %v1248_v7 = vpop.f32.mrf.mxu0  ;;  %v111_v47 = vrot.slane %v94_v12, %v5192_v58 }
 0x13c   :  { %v1291_v11 = vpop.f32.mrf.mxu1  ;;  %v5340_v1 = vadd.f32 %v1248_v7, %v1167_v13  ;;  %v180_v62 = vadd.f32 %v5169_v48, %v99_v14  ;;  %v184_v50 = vadd.f32 %v5182_v54, %v99_v14  ;;  %v186_v58 = vadd.f32 %v5196_v60, %v103_v2 }
 0x13d   :  { %5789 = vst [vmem:[#allocation72_spill] sm:$0xff] %v5338_v4  ;;  %v5342_v15 = vadd.f32 %v1291_v11, %v1175_v3  ;;  %v182_v4 = vadd.f32 %v5175_v51, %v103_v2  ;;  %v225_v3 = vadd.f32 %v5177_v52, %v111_v47 }
 0x13e   :  { %5790 = vst [vmem:[#allocation73_spill] sm:$0xff] %v5340_v1 }
 0x13f   :  { %5791 = vst [vmem:[#allocation74_spill] sm:$0xff] %v5342_v15 }
 0x155   :  { %v1540_v5 = vpop.f32.mrf.mxu0 }
 0x156   :  { %v1583_v46 = vpop.f32.mrf.mxu1  ;;  %v1592_v13 = vadd.f32 %v1540_v5, %v180_v62  ;;  %v229_v5 = vadd.f32 %v5198_v61, %v111_v47 }
 0x157   :  { %v1542_v7 = vpop.f32.mrf.mxu0 }
 0x158   :  { %v1585_v11 = vpop.f32.mrf.mxu1  ;;  %v1600_v15 = vmul.f32 0.5, %v1592_v13  ;;  %v1593_v1 = vadd.f32 %v1542_v7, %v182_v4  ;;  %v107_v4 = vrot.slane %v94_v12, %v5180_v53 }
 0x159   :  { %v1595_v10 = vadd.f32 %v1585_v11, %v225_v3  ;;  %v1544_v9 = vpop.f32.mrf.mxu0 }
 0x15a   :  { %v1587_v57 = vpop.f32.mrf.mxu1  ;;  %4619 = vtanh.f32 %v1600_v15  ;;  %v1601_v48 = vmul.f32 0.5, %v1593_v1  ;;  %v1596_v59 = vadd.f32 %v1544_v9, %v184_v50  ;;  %v223_v13 = vadd.f32 %v5171_v49, %v107_v4 }
 0x15b   :  { %v1546_v6 = vpop.f32.mrf.mxu0  ;;  %v227_v60 = vadd.f32 %v5184_v55, %v107_v4 }
 0x15c   :  { %4621 = vtanh.f32 %v1601_v48  ;;  %v1603_v51 = vmul.f32 0.5, %v1596_v59  ;;  %v1597_v62 = vadd.f32 %v1546_v6, %v186_v58  ;;  %v1589_v52 = vpop.f32.mrf.mxu1  ;;  %v1594_v1 = vadd.f32 %v1583_v46, %v223_v13 }
 0x15d   :  { %4623 = vtanh.f32 %v1595_v10  ;;  %v1599_v14 = vadd.f32 %v1589_v52, %v229_v5  ;;  %v1598_v9 = vadd.f32 %v1587_v57, %v227_v60 }
 0x15e   :  { %4625 = vtanh.f32 %v1603_v51  ;;  %v1604_v54 = vmul.f32 0.5, %v1597_v62  ;;  %v1602_v10 = vmul.f32 0.5, %v1594_v1 }
 0x15f   :  { %v1605_v47 = vmul.f32 0.5, %v1598_v9 }
 0x160   :  { %4627 = vtanh.f32 %v1604_v54 }
 0x161   :  { %4629 = vtanh.f32 %v1599_v14 }
 0x162   :  { %4631 = vtanh.f32 %v1602_v10  ;;  %v5792_v10 = vmov 0  }
 0x163   :  { %4633 = vtanh.f32 %v1605_v47 }
 0x167   :  { %v4620_v15 = vpop.eup %4619 }
 0x168   :  { %v1612_v59 = vmul.f32 0.5, %v4620_v15 }
 0x169   :  { %v4622_v6 = vpop.eup %4621 }
 0x16a   :  { %v4624_v2 = vpop.eup %4623  ;;  %v1618_v3 = vadd.f32 0.5, %v1612_v59  ;;  %v1613_v61 = vmul.f32 0.5, %v4622_v6 }
 0x16b   :  { %v4626_v7 = vpop.eup %4625 }
 0x16c   :  { %v1619_v11 = vadd.f32 0.5, %v1613_v61  ;;  %v1630_v53 = vmul.f32 %v4624_v2, %v1618_v3  ;;  %v1615_v12 = vmul.f32 0.5, %v4626_v7 }
 0x16d   :  { %v4628_v50 = vpop.eup %4627 }
 0x16e   :  { %v1628_v49 = vmul.f32 0.0, %v1619_v11  ;;  %v1621_v58 = vadd.f32 0.5, %v1615_v12  ;;  %v1616_v55 = vmul.f32 0.5, %v4628_v50  ;;  %v4630_v48 = vpop.eup %4629 }
 0x16f   :  { %v4632_v5 = vpop.eup %4631 }
 0x170   :  { %v5359_v46 = vadd.f32 %v1630_v53, %v1628_v49  ;;  %v1622_v57 = vadd.f32 0.5, %v1616_v55  ;;  %v1631_v62 = vmul.f32 %v4630_v48, %v1621_v58  ;;  %v4634_v54 = vpop.eup %4633  ;;  %v1614_v4 = vmul.f32 0.5, %v4632_v5 }
 0x171   :  { %v1617_v14 = vmul.f32 0.5, %v4634_v54 }
 0x172   :  { %v1629_v51 = vmul.f32 0.0, %v1622_v57  ;;  %4635 = vtanh.f32 %v5359_v46  ;;  %v1620_v60 = vadd.f32 0.5, %v1614_v4 }
 0x173   :  { %v1623_v1 = vadd.f32 0.5, %v1617_v14 }
 0x174   :  { %v5362_v52 = vadd.f32 %v1631_v62, %v1629_v51 }
 0x176   :  { %4637 = vtanh.f32 %v5362_v52 }
 0x17f   :  { %v4636_v13 = vpop.eup %4635 }
 0x180   :  { %v1636_v15 = vmul.f32 %v4636_v13, %v1620_v60 }
 0x183   :  { %v4638_v9 = vpop.eup %4637 }
 0x184   :  { %v1637_v59 = vmul.f32 %v4638_v9, %v1623_v1 }
 0x186   :  { %v1652_v6 = vpack.c.bf16 %v1637_v59, %v1636_v15 }
 0x188   :  { %1878 = vmatmul.mubr.bf16.vlgmr.msra.gmra.mxu0 %v1652_v6  ;;  %1921 = vmatmul.mubr.bf16.vlgmr.msra.gmra.mxu1 %v1652_v6 }
 0x189   :  { %2185 = vmatpush1.bf16.msra.mxu0 %v5039_v16  ;;  %2228 = vmatpush1.bf16.msra.mxu1 %v5041_v17  ;;  %v251_v16 = vrot.slane %v5186_v56, %v5345_v63 }
 0x18a   :  { %2186 = vmatprep.subr.bf16.mxu0 %v5043_v18  ;;  %2229 = vmatprep.subr.bf16.mxu1 %v5045_v19 }
 0x18b   :  { %2216 = vmatprep.mubr.bf16.mxu0 %v5792_v10  ;;  %2259 = vmatprep.mubr.bf16.mxu1 %v5792_v10  ;;  %v331_v17 = vadd.f32 %v5204_v0, %v251_v16 }
 0x18d   :  { %2187 = vmatpush1.bf16.msra.mxu0 %v5051_v20  ;;  %2230 = vmatpush1.bf16.msra.mxu1 %v5053_v21 }
 0x18e   :  { %2188 = vmatprep.subr.bf16.mxu0 %v5057_v22  ;;  %2231 = vmatprep.subr.bf16.mxu1 %v5059_v23  ;;  %v335_v23 = vadd.f32 %v5212_v8, %v251_v16 }
 0x191   :  { %2189 = vmatpush1.bf16.msra.mxu0 %v5065_v24  ;;  %2232 = vmatpush1.bf16.msra.mxu1 %v5067_v25  ;;  %v5793_v25 = vld [vmem:[#allocation20_spill] sm:$0xff] }
 0x192   :  { %2190 = vmatprep.subr.bf16.mxu0 %v5071_v26  ;;  %2233 = vmatprep.subr.bf16.mxu1 %v5073_v27  ;;  %v5794_v27 = vld [vmem:[#allocation21_spill] sm:$0xff] }
 0x195   :  { %2191 = vmatpush1.bf16.msra.mxu0 %v5077_v28  ;;  %2234 = vmatpush1.bf16.msra.mxu1 %v5079_v29 }
 0x196   :  { %2192 = vmatprep.subr.bf16.mxu0 %v5083_v30  ;;  %2235 = vmatprep.subr.bf16.mxu1 %v5085_v31 }
 0x199   :  { %2193 = vmatpush1.bf16.msra.mxu0 %v5089_v32  ;;  %2236 = vmatpush1.bf16.msra.mxu1 %v5091_v33 }
 0x19a   :  { %2194 = vmatprep.subr.bf16.mxu0 %v5095_v34  ;;  %2237 = vmatprep.subr.bf16.mxu1 %v5097_v35 }
 0x19d   :  { %2195 = vmatpush1.bf16.msra.mxu0 %v5101_v36  ;;  %2238 = vmatpush1.bf16.msra.mxu1 %v5103_v37  ;;  %v5795_v36 = vld [vmem:[#allocation24_spill] sm:$0xff] }
 0x19e   :  { %2196 = vmatprep.subr.bf16.mxu0 %v5107_v38  ;;  %2239 = vmatprep.subr.bf16.mxu1 %v5109_v39  ;;  %v5796_v39 = vld [vmem:[#allocation25_spill] sm:$0xff] }
 0x1a1   :  { %2197 = vmatpush1.bf16.msra.mxu0 %v5113_v40  ;;  %2240 = vmatpush1.bf16.msra.mxu1 %v5115_v41  ;;  %v5797_v41 = vld [vmem:[#allocation19_spill] sm:$0xff] }
 0x1a2   :  { %2198 = vmatprep.subr.bf16.mxu0 %v5119_v42  ;;  %2241 = vmatprep.subr.bf16.mxu1 %v5121_v43  ;;  %v5798_v43 = vld [vmem:[#allocation23_spill] sm:$0xff] }
 0x1a5   :  { %2199 = vmatpush1.bf16.msra.mxu0 %v5125_v44  ;;  %2242 = vmatpush1.bf16.msra.mxu1 %v5127_v45 }
 0x248   :  { %v1879_v18 = vpop.f32.mrf.mxu0  ;;  %v1922_v19 = vpop.f32.mrf.mxu1 }
 0x249   :  { %v1931_v20 = vadd.f32 %v1879_v18, %v331_v17  ;;  %v1933_v42 = vadd.f32 %v1922_v19, %v5797_v41  ;;  %v5419_v17 = vld [vmem:[#allocation11 + $0xec] ss:$16 sps:$4 sm:$0xff]   ;;  %v5421_v18 = vld [vmem:[#allocation11 + $0xe0] ss:$16 sps:$4 sm:$0xff]   ;;  %v5423_v19 = vld [vmem:[#allocation11 + $0xe8] ss:$16 sps:$4 sm:$0xff]  }
 0x24a   :  { %v1881_v21 = vpop.f32.mrf.mxu0  ;;  %v1924_v22 = vpop.f32.mrf.mxu1  ;;  %2566 = vmatprep.subr.bf16.mxu1 %v5419_v17  ;;  %v5489_v41 = vld [vmem:[#allocation11 + $0x2c] ss:$16 sps:$4 sm:$0xff]  }
 0x24b   :  { %v1939_v24 = vmul.f32 0.5, %v1931_v20  ;;  %v1932_v26 = vadd.f32 %v1881_v21, %v5793_v25  ;;  %v1934_v28 = vadd.f32 %v1924_v22, %v5794_v27  ;;  %v1941_v8 = vmul.f32 0.5, %v1933_v42  ;;  %v5429_v20 = vld [vmem:[#allocation11 + $0xc4] ss:$16 sps:$4 sm:$0xff]   ;;  %v5431_v21 = vld [vmem:[#allocation11 + $0xcc] ss:$16 sps:$4 sm:$0xff]  }
 0x24c   :  { %v1883_v29 = vpop.f32.mrf.mxu0  ;;  %v1926_v30 = vpop.f32.mrf.mxu1  ;;  %v5433_v22 = vld [vmem:[#allocation11 + $0xc0] ss:$16 sps:$4 sm:$0xff]   ;;  %v5443_v25 = vld [vmem:[#allocation11 + $0xac] ss:$16 sps:$4 sm:$0xff]   ;;  %v5447_v27 = vld [vmem:[#allocation11 + $0xa8] ss:$16 sps:$4 sm:$0xff]  }
 0x24d   :  { %4639 = vtanh.f32 %v1939_v24  ;;  %v1940_v31 = vmul.f32 0.5, %v1932_v26  ;;  %v1935_v32 = vadd.f32 %v1883_v29, %v335_v23  ;;  %v1937_v44 = vadd.f32 %v1926_v30, %v5798_v43  ;;  %v5435_v23 = vld [vmem:[#allocation11 + $0xc8] ss:$16 sps:$4 sm:$0xff]   ;;  %v5441_v24 = vld [vmem:[#allocation11 + $0xa4] ss:$16 sps:$4 sm:$0xff]  }
 0x24e   :  { %v1885_v33 = vpop.f32.mrf.mxu0  ;;  %v1928_v34 = vpop.f32.mrf.mxu1  ;;  %v5445_v26 = vld [vmem:[#allocation11 + $0xa0] ss:$16 sps:$4 sm:$0xff]   ;;  %v5455_v29 = vld [vmem:[#allocation11 + $0x8c] ss:$16 sps:$4 sm:$0xff]   ;;  %v5495_v43 = vld [vmem:[#allocation11 + $0x28] ss:$16 sps:$4 sm:$0xff]  }
 0x24f   :  { %4641 = vtanh.f32 %v1940_v31  ;;  %v1942_v35 = vmul.f32 0.5, %v1935_v32  ;;  %v1936_v37 = vadd.f32 %v1885_v33, %v5795_v36  ;;  %v1938_v40 = vadd.f32 %v1928_v34, %v5796_v39  ;;  %v5457_v30 = vld [vmem:[#allocation11 + $0x80] ss:$16 sps:$4 sm:$0xff]   ;;  %v5459_v31 = vld [vmem:[#allocation11 + $0x88] ss:$16 sps:$4 sm:$0xff]  }
 0x250   :  { %4643 = vtanh.f32 %v1934_v28  ;;  %v1944_v47 = vmul.f32 0.5, %v1937_v44  ;;  %v5453_v28 = vld [vmem:[#allocation11 + $0x84] ss:$16 sps:$4 sm:$0xff]   ;;  %v5465_v33 = vld [vmem:[#allocation11 + $0x6c] ss:$16 sps:$4 sm:$0xff]  }
 0x251   :  { %4645 = vtanh.f32 %v1942_v35  ;;  %v1943_v38 = vmul.f32 0.5, %v1936_v37  ;;  %v5463_v32 = vld [vmem:[#allocation11 + $0x64] ss:$16 sps:$4 sm:$0xff]   ;;  %v5469_v34 = vld [vmem:[#allocation11 + $0x60] ss:$16 sps:$4 sm:$0xff]  }
 0x252   :  { %v5471_v35 = vld [vmem:[#allocation11 + $0x68] ss:$16 sps:$4 sm:$0xff]   ;;  %v5475_v36 = vld [vmem:[#allocation11 + $0x44] ss:$16 sps:$4 sm:$0xff]   ;;  %v5477_v37 = vld [vmem:[#allocation11 + $0x4c] ss:$16 sps:$4 sm:$0xff]  }
 0x253   :  { %4647 = vtanh.f32 %v1943_v38  ;;  %v5481_v38 = vld [vmem:[#allocation11 + $0x40] ss:$16 sps:$4 sm:$0xff]   ;;  %v5483_v39 = vld [vmem:[#allocation11 + $0x48] ss:$16 sps:$4 sm:$0xff]   ;;  %v5499_v44 = vld [vmem:[#allocation11 + $0x4] ss:$16 sps:$4 sm:$0xff]  }
 0x254   :  { %4649 = vtanh.f32 %v1938_v40  ;;  %v5487_v40 = vld [vmem:[#allocation11 + $0x24] ss:$16 sps:$4 sm:$0xff]   ;;  %v5493_v42 = vld [vmem:[#allocation11 + $0x20] ss:$16 sps:$4 sm:$0xff]  }
 0x255   :  { %4651 = vtanh.f32 %v1941_v8  ;;  %v5799_v8 = vld [vmem:[#allocation22_spill] sm:$0xff] }
 0x256   :  { %4653 = vtanh.f32 %v1944_v47 }
 0x25a   :  { %v4640_v45 = vpop.eup %4639 }
 0x25b   :  { %v1951_v56 = vmul.f32 0.5, %v4640_v45  ;;  %v5501_v45 = vld [vmem:[#allocation11 + $0xc] ss:$16 sps:$4 sm:$0xff]  }
 0x25c   :  { %v4642_v0 = vpop.eup %4641 }
 0x25d   :  { %v4644_v2 = vpop.eup %4643  ;;  %v1957_v3 = vadd.f32 0.5, %v1951_v56  ;;  %v1952_v61 = vmul.f32 0.5, %v4642_v0  ;;  %v5505_v56 = vld [vmem:[#allocation11] ss:$16 sps:$4 sm:$0xff]   ;;  %v5507_v0 = vld [vmem:[#allocation11 + $0x8] ss:$16 sps:$4 sm:$0xff]  }
 0x25e   :  { %v4646_v7 = vpop.eup %4645 }
 0x25f   :  { %v1958_v11 = vadd.f32 0.5, %v1952_v61  ;;  %v1969_v53 = vmul.f32 %v4644_v2, %v1957_v3  ;;  %v1954_v12 = vmul.f32 0.5, %v4646_v7  ;;  %v403_v2 = vrot.slane %v5799_v8, %v5345_v63  ;;  %v5800_v3 = vld [vmem:[#allocation26_spill] sm:$0xff]  ;;  %v5806_v8 = vld [vmem:[#allocation27_spill] sm:$0xff] }
 0x260   :  { %v4648_v50 = vpop.eup %4647 }
 0x261   :  { %v1967_v49 = vmul.f32 %v1958_v11, %v5359_v46  ;;  %v1960_v58 = vadd.f32 0.5, %v1954_v12  ;;  %v1955_v55 = vmul.f32 0.5, %v4648_v50  ;;  %v4650_v57 = vpop.eup %4649  ;;  %v483_v61 = vadd.f32 %v5800_v3, %v403_v2  ;;  %v5801_v50 = vld [vmem:[#allocation30_spill] sm:$0xff]  ;;  %v5807_v3 = vld [vmem:[#allocation32_spill] sm:$0xff] }
 0x262   :  { %v4652_v4 = vpop.eup %4651 }
 0x263   :  { %v5408_v48 = vadd.f32 %v1969_v53, %v1967_v49  ;;  %v1961_v51 = vadd.f32 0.5, %v1955_v55  ;;  %v1970_v62 = vmul.f32 %v4650_v57, %v1960_v58  ;;  %v4654_v14 = vpop.eup %4653  ;;  %v1953_v13 = vmul.f32 0.5, %v4652_v4  ;;  %v5802_v55 = vld [vmem:[#allocation28_spill] sm:$0xff] }
 0x264   :  { %v1956_v46 = vmul.f32 0.5, %v4654_v14  ;;  %v487_v49 = vadd.f32 %v5801_v50, %v403_v2 }
 0x265   :  { %v1968_v5 = vmul.f32 %v1961_v51, %v5362_v52  ;;  %4655 = vtanh.f32 %v5408_v48  ;;  %v1959_v1 = vadd.f32 0.5, %v1953_v13  ;;  %v5417_v52 = vld [vmem:[#allocation11 + $0xe4] ss:$16 sps:$4 sm:$0xff]  }
 0x266   :  { %v1962_v9 = vadd.f32 0.5, %v1956_v46  ;;  %2523 = vmatprep.subr.bf16.mxu0 %v5417_v52  ;;  %v5803_v51 = vld [vmem:[#allocation29_spill] sm:$0xff] }
 0x267   :  { %v5412_v54 = vadd.f32 %v1970_v62, %v1968_v5 }
 0x269   :  { %4657 = vtanh.f32 %v5412_v54 }
 0x272   :  { %v4656_v60 = vpop.eup %4655 }
 0x273   :  { %v1975_v59 = vmul.f32 %v4656_v60, %v1959_v1 }
 0x276   :  { %v4658_v15 = vpop.eup %4657 }
 0x277   :  { %v1976_v6 = vmul.f32 %v4658_v15, %v1962_v9  ;;  %v5804_v9 = vld [vmem:[#allocation33_spill] sm:$0xff] }
 0x279   :  { %v1991_v16 = vpack.c.bf16 %v1976_v6, %v1975_v59  ;;  %v5805_v6 = vld [vmem:[#allocation34_spill] sm:$0xff] }
 0x27b   :  { %2217 = vmatmul.mubr.bf16.vlgmr.msra.gmra.mxu0 %v1991_v16  ;;  %2260 = vmatmul.mubr.bf16.vlgmr.msra.gmra.mxu1 %v1991_v16 }
 0x27c   :  { %2555 = vmatprep.mubr.bf16.mxu0 %v5792_v10  ;;  %2598 = vmatprep.mubr.bf16.mxu1 %v5792_v10 }
 0x27d   :  { %2524 = vmatpush1.bf16.msra.mxu0 %v5421_v18  ;;  %2567 = vmatpush1.bf16.msra.mxu1 %v5423_v19 }
 0x27e   :  { %2525 = vmatprep.subr.bf16.mxu0 %v5429_v20  ;;  %2568 = vmatprep.subr.bf16.mxu1 %v5431_v21 }
 0x281   :  { %2526 = vmatpush1.bf16.msra.mxu0 %v5433_v22  ;;  %2569 = vmatpush1.bf16.msra.mxu1 %v5435_v23 }
 0x282   :  { %2527 = vmatprep.subr.bf16.mxu0 %v5441_v24  ;;  %2570 = vmatprep.subr.bf16.mxu1 %v5443_v25 }
 0x285   :  { %2528 = vmatpush1.bf16.msra.mxu0 %v5445_v26  ;;  %2571 = vmatpush1.bf16.msra.mxu1 %v5447_v27 }
 0x286   :  { %2529 = vmatprep.subr.bf16.mxu0 %v5453_v28  ;;  %2572 = vmatprep.subr.bf16.mxu1 %v5455_v29 }
 0x289   :  { %2530 = vmatpush1.bf16.msra.mxu0 %v5457_v30  ;;  %2573 = vmatpush1.bf16.msra.mxu1 %v5459_v31 }
 0x28a   :  { %2531 = vmatprep.subr.bf16.mxu0 %v5463_v32  ;;  %2574 = vmatprep.subr.bf16.mxu1 %v5465_v33 }
 0x28d   :  { %2532 = vmatpush1.bf16.msra.mxu0 %v5469_v34  ;;  %2575 = vmatpush1.bf16.msra.mxu1 %v5471_v35 }
 0x28e   :  { %2533 = vmatprep.subr.bf16.mxu0 %v5475_v36  ;;  %2576 = vmatprep.subr.bf16.mxu1 %v5477_v37 }
 0x291   :  { %2534 = vmatpush1.bf16.msra.mxu0 %v5481_v38  ;;  %2577 = vmatpush1.bf16.msra.mxu1 %v5483_v39 }
 0x292   :  { %2535 = vmatprep.subr.bf16.mxu0 %v5487_v40  ;;  %2578 = vmatprep.subr.bf16.mxu1 %v5489_v41 }
 0x295   :  { %2536 = vmatpush1.bf16.msra.mxu0 %v5493_v42  ;;  %2579 = vmatpush1.bf16.msra.mxu1 %v5495_v43 }
 0x296   :  { %2537 = vmatprep.subr.bf16.mxu0 %v5499_v44  ;;  %2580 = vmatprep.subr.bf16.mxu1 %v5501_v45 }
 0x299   :  { %2538 = vmatpush1.bf16.msra.mxu0 %v5505_v56  ;;  %2581 = vmatpush1.bf16.msra.mxu1 %v5507_v0 }
 0x29a   :  { %2862 = vmatprep.subr.bf16.mxu0 %v5417_v52  ;;  %2905 = vmatprep.subr.bf16.mxu1 %v5419_v17 }
 0x33b   :  { %v2218_v47 = vpop.f32.mrf.mxu0  ;;  %v2261_v7 = vpop.f32.mrf.mxu1 }
 0x33c   :  { %v2270_v11 = vadd.f32 %v2218_v47, %v483_v61  ;;  %v2272_v2 = vadd.f32 %v2261_v7, %v5806_v8 }
 0x33d   :  { %v2220_v53 = vpop.f32.mrf.mxu0  ;;  %v2263_v12 = vpop.f32.mrf.mxu1 }
 0x33e   :  { %v2278_v58 = vmul.f32 0.5, %v2270_v11  ;;  %v2271_v57 = vadd.f32 %v2220_v53, %v5802_v55  ;;  %v2273_v62 = vadd.f32 %v2263_v12, %v5803_v51  ;;  %v2280_v12 = vmul.f32 0.5, %v2272_v2 }
 0x33f   :  { %v2222_v5 = vpop.f32.mrf.mxu0  ;;  %v2265_v4 = vpop.f32.mrf.mxu1 }
 0x340   :  { %4659 = vtanh.f32 %v2278_v58  ;;  %v2279_v14 = vmul.f32 0.5, %v2271_v57  ;;  %v2274_v13 = vadd.f32 %v2222_v5, %v487_v49  ;;  %v2276_v61 = vadd.f32 %v2265_v4, %v5807_v3 }
 0x341   :  { %v2224_v46 = vpop.f32.mrf.mxu0  ;;  %v2267_v60 = vpop.f32.mrf.mxu1 }
 0x342   :  { %4661 = vtanh.f32 %v2279_v14  ;;  %v2281_v1 = vmul.f32 0.5, %v2274_v13  ;;  %v2275_v15 = vadd.f32 %v2224_v46, %v5804_v9  ;;  %v2277_v16 = vadd.f32 %v2267_v60, %v5805_v6 }
 0x343   :  { %4663 = vtanh.f32 %v2273_v62  ;;  %v2283_v55 = vmul.f32 0.5, %v2276_v61 }
 0x344   :  { %4665 = vtanh.f32 %v2281_v1  ;;  %v2282_v59 = vmul.f32 0.5, %v2275_v15 }
 0x346   :  { %4667 = vtanh.f32 %v2282_v59 }
 0x347   :  { %4669 = vtanh.f32 %v2277_v16 }
 0x348   :  { %4671 = vtanh.f32 %v2280_v12 }
 0x349   :  { %4673 = vtanh.f32 %v2283_v55 }
 0x34d   :  { %v4660_v47 = vpop.eup %4659 }
 0x34e   :  { %v2290_v11 = vmul.f32 0.5, %v4660_v47 }
 0x34f   :  { %v4662_v53 = vpop.eup %4661 }
 0x350   :  { %v4664_v50 = vpop.eup %4663  ;;  %v2296_v49 = vadd.f32 0.5, %v2290_v11  ;;  %v2291_v58 = vmul.f32 0.5, %v4662_v53 }
 0x351   :  { %v4666_v57 = vpop.eup %4665 }
 0x352   :  { %v2297_v51 = vadd.f32 0.5, %v2291_v58  ;;  %v2308_v62 = vmul.f32 %v4664_v50, %v2296_v49  ;;  %v2293_v5 = vmul.f32 0.5, %v4666_v57  ;;  %v5809_v49 = vld [vmem:[#allocation35_spill] sm:$0xff] }
 0x353   :  { %v4668_v14 = vpop.eup %4667 }
 0x354   :  { %v2306_v13 = vmul.f32 %v2297_v51, %v5408_v48  ;;  %v2299_v46 = vadd.f32 0.5, %v2293_v5  ;;  %v2294_v7 = vmul.f32 0.5, %v4668_v14  ;;  %v4670_v4 = vpop.eup %4669  ;;  %v5810_v14 = vld [vmem:[#allocation39_spill] sm:$0xff] }
 0x355   :  { %v4672_v6 = vpop.eup %4671 }
 0x356   :  { %v5526_v60 = vadd.f32 %v2308_v62, %v2306_v13  ;;  %v2300_v1 = vadd.f32 0.5, %v2294_v7  ;;  %v2309_v9 = vmul.f32 %v4670_v4, %v2299_v46  ;;  %v4674_v16 = vpop.eup %4673  ;;  %v2292_v8 = vmul.f32 0.5, %v4672_v6  ;;  %v5811_v7 = vld [vmem:[#allocation37_spill] sm:$0xff] }
 0x357   :  { %v2295_v48 = vmul.f32 0.5, %v4674_v16 }
 0x358   :  { %v2307_v15 = vmul.f32 %v2300_v1, %v5412_v54  ;;  %4675 = vtanh.f32 %v5526_v60  ;;  %v2298_v3 = vadd.f32 0.5, %v2292_v8  ;;  %v5808_v54 = vld [vmem:[#allocation31_spill] sm:$0xff]  ;;  %v5812_v1 = vld [vmem:[#allocation38_spill] sm:$0xff] }
 0x359   :  { %v2301_v61 = vadd.f32 0.5, %v2295_v48  ;;  %v555_v50 = vrot.slane %v5808_v54, %v5345_v63  ;;  %v5815_v54 = vld [vmem:[#allocation36_spill] sm:$0xff] }
 0x35a   :  { %v5530_v59 = vadd.f32 %v2309_v9, %v2307_v15 }
 0x35b   :  { %v635_v58 = vadd.f32 %v5809_v49, %v555_v50  ;;  %v639_v13 = vadd.f32 %v5810_v14, %v555_v50  ;;  %v5816_v49 = vld [vmem:[#allocation40_spill] sm:$0xff] }
 0x35c   :  { %4677 = vtanh.f32 %v5530_v59 }
 0x365   :  { %v4676_v2 = vpop.eup %4675 }
 0x366   :  { %v2314_v11 = vmul.f32 %v4676_v2, %v2298_v3 }
 0x369   :  { %v4678_v47 = vpop.eup %4677 }
 0x36a   :  { %v2315_v53 = vmul.f32 %v4678_v47, %v2301_v61  ;;  %v5813_v61 = vld [vmem:[#allocation41_spill] sm:$0xff] }
 0x36c   :  { %v2330_v12 = vpack.c.bf16 %v2315_v53, %v2314_v11  ;;  %v5814_v53 = vld [vmem:[#allocation42_spill] sm:$0xff] }
 0x36e   :  { %2556 = vmatmul.mubr.bf16.vlgmr.msra.gmra.mxu0 %v2330_v12  ;;  %2599 = vmatmul.mubr.bf16.vlgmr.msra.gmra.mxu1 %v2330_v12 }
 0x36f   :  { %2863 = vmatpush1.bf16.msra.mxu0 %v5421_v18  ;;  %2906 = vmatpush1.bf16.msra.mxu1 %v5423_v19 }
 0x370   :  { %2864 = vmatprep.subr.bf16.mxu0 %v5429_v20  ;;  %2907 = vmatprep.subr.bf16.mxu1 %v5431_v21 }
 0x371   :  { %2894 = vmatprep.mubr.bf16.mxu0 %v5792_v10  ;;  %2937 = vmatprep.mubr.bf16.mxu1 %v5792_v10 }
 0x373   :  { %2865 = vmatpush1.bf16.msra.mxu0 %v5433_v22  ;;  %2908 = vmatpush1.bf16.msra.mxu1 %v5435_v23 }
 0x374   :  { %2866 = vmatprep.subr.bf16.mxu0 %v5441_v24  ;;  %2909 = vmatprep.subr.bf16.mxu1 %v5443_v25 }
 0x377   :  { %2867 = vmatpush1.bf16.msra.mxu0 %v5445_v26  ;;  %2910 = vmatpush1.bf16.msra.mxu1 %v5447_v27 }
 0x378   :  { %2868 = vmatprep.subr.bf16.mxu0 %v5453_v28  ;;  %2911 = vmatprep.subr.bf16.mxu1 %v5455_v29 }
 0x37b   :  { %2869 = vmatpush1.bf16.msra.mxu0 %v5457_v30  ;;  %2912 = vmatpush1.bf16.msra.mxu1 %v5459_v31 }
 0x37c   :  { %2870 = vmatprep.subr.bf16.mxu0 %v5463_v32  ;;  %2913 = vmatprep.subr.bf16.mxu1 %v5465_v33 }
 0x37f   :  { %2871 = vmatpush1.bf16.msra.mxu0 %v5469_v34  ;;  %2914 = vmatpush1.bf16.msra.mxu1 %v5471_v35 }
 0x380   :  { %2872 = vmatprep.subr.bf16.mxu0 %v5475_v36  ;;  %2915 = vmatprep.subr.bf16.mxu1 %v5477_v37 }
 0x383   :  { %2873 = vmatpush1.bf16.msra.mxu0 %v5481_v38  ;;  %2916 = vmatpush1.bf16.msra.mxu1 %v5483_v39 }
 0x384   :  { %2874 = vmatprep.subr.bf16.mxu0 %v5487_v40  ;;  %2917 = vmatprep.subr.bf16.mxu1 %v5489_v41 }
 0x387   :  { %2875 = vmatpush1.bf16.msra.mxu0 %v5493_v42  ;;  %2918 = vmatpush1.bf16.msra.mxu1 %v5495_v43 }
 0x388   :  { %2876 = vmatprep.subr.bf16.mxu0 %v5499_v44  ;;  %2919 = vmatprep.subr.bf16.mxu1 %v5501_v45 }
 0x38b   :  { %2877 = vmatpush1.bf16.msra.mxu0 %v5505_v56  ;;  %2920 = vmatpush1.bf16.msra.mxu1 %v5507_v0 }
 0x38c   :  { %3201 = vmatprep.subr.bf16.mxu0 %v5417_v52  ;;  %3244 = vmatprep.subr.bf16.mxu1 %v5419_v17 }
 0x42e   :  { %v2557_v55 = vpop.f32.mrf.mxu0  ;;  %v2600_v57 = vpop.f32.mrf.mxu1 }
 0x42f   :  { %v2609_v51 = vadd.f32 %v2557_v55, %v635_v58  ;;  %v2611_v50 = vadd.f32 %v2600_v57, %v5815_v54 }
 0x430   :  { %v2559_v62 = vpop.f32.mrf.mxu0  ;;  %v2602_v5 = vpop.f32.mrf.mxu1 }
 0x431   :  { %v2617_v46 = vmul.f32 0.5, %v2609_v51  ;;  %v2610_v4 = vadd.f32 %v2559_v62, %v5811_v7  ;;  %v2612_v9 = vadd.f32 %v2602_v5, %v5812_v1  ;;  %v2619_v5 = vmul.f32 0.5, %v2611_v50 }
 0x432   :  { %v2561_v15 = vpop.f32.mrf.mxu0  ;;  %v2604_v6 = vpop.f32.mrf.mxu1 }
 0x433   :  { %4679 = vtanh.f32 %v2617_v46  ;;  %v2618_v16 = vmul.f32 0.5, %v2610_v4  ;;  %v2613_v8 = vadd.f32 %v2561_v15, %v639_v13  ;;  %v2615_v58 = vadd.f32 %v2604_v6, %v5816_v49 }
 0x434   :  { %v2563_v48 = vpop.f32.mrf.mxu0  ;;  %v2606_v2 = vpop.f32.mrf.mxu1 }
 0x435   :  { %4681 = vtanh.f32 %v2618_v16  ;;  %v2620_v3 = vmul.f32 0.5, %v2613_v8  ;;  %v2614_v47 = vadd.f32 %v2563_v48, %v5813_v61  ;;  %v2616_v12 = vadd.f32 %v2606_v2, %v5814_v53 }
 0x436   :  { %4683 = vtanh.f32 %v2612_v9  ;;  %v2622_v7 = vmul.f32 0.5, %v2615_v58 }
 0x437   :  { %4685 = vtanh.f32 %v2620_v3  ;;  %v2621_v11 = vmul.f32 0.5, %v2614_v47 }
 0x439   :  { %4687 = vtanh.f32 %v2621_v11 }
 0x43a   :  { %4689 = vtanh.f32 %v2616_v12 }
 0x43b   :  { %4691 = vtanh.f32 %v2619_v5 }
 0x43c   :  { %4693 = vtanh.f32 %v2622_v7 }
 0x440   :  { %v4680_v55 = vpop.eup %4679 }
 0x441   :  { %v2629_v51 = vmul.f32 0.5, %v4680_v55 }
 0x442   :  { %v4682_v62 = vpop.eup %4681 }
 0x443   :  { %v4684_v14 = vpop.eup %4683  ;;  %v2635_v13 = vadd.f32 0.5, %v2629_v51  ;;  %v2630_v46 = vmul.f32 0.5, %v4682_v62 }
 0x444   :  { %v4686_v4 = vpop.eup %4685 }
 0x445   :  { %v2636_v1 = vadd.f32 0.5, %v2630_v46  ;;  %v2647_v9 = vmul.f32 %v4684_v14, %v2635_v13  ;;  %v2632_v15 = vmul.f32 0.5, %v4686_v4  ;;  %v5817_v13 = vld [vmem:[#allocation43_spill] sm:$0xff] }
 0x446   :  { %v4688_v16 = vpop.eup %4687 }
 0x447   :  { %v2645_v8 = vmul.f32 %v2636_v1, %v5526_v60  ;;  %v2638_v48 = vadd.f32 0.5, %v2632_v15  ;;  %v2633_v57 = vmul.f32 0.5, %v4688_v16  ;;  %v4690_v6 = vpop.eup %4689  ;;  %v5818_v16 = vld [vmem:[#allocation47_spill] sm:$0xff] }
 0x448   :  { %v4692_v53 = vpop.eup %4691 }
 0x449   :  { %v5578_v2 = vadd.f32 %v2647_v9, %v2645_v8  ;;  %v2639_v3 = vadd.f32 0.5, %v2633_v57  ;;  %v2648_v61 = vmul.f32 %v4690_v6, %v2638_v48  ;;  %v4694_v12 = vpop.eup %4693  ;;  %v2631_v54 = vmul.f32 0.5, %v4692_v53  ;;  %v5819_v57 = vld [vmem:[#allocation45_spill] sm:$0xff] }
 0x44a   :  { %v2634_v60 = vmul.f32 0.5, %v4694_v12 }
 0x44b   :  { %v2646_v47 = vmul.f32 %v2639_v3, %v5530_v59  ;;  %4695 = vtanh.f32 %v5578_v2  ;;  %v2637_v49 = vadd.f32 0.5, %v2631_v54  ;;  %v4781_v59 = vld [vmem:[#allocation12] sm:$0xf] }
 0x44c   :  { %v2640_v58 = vadd.f32 0.5, %v2634_v60  ;;  %v707_v14 = vrot.slane %v4781_v59, %v5345_v63  ;;  %v5820_v3 = vld [vmem:[#allocation46_spill] sm:$0xff]  ;;  %v5824_v59 = vld [vmem:[#allocation48_spill] sm:$0xff] }
 0x44d   :  { %v5582_v11 = vadd.f32 %v2648_v61, %v2646_v47 }
 0x44e   :  { %v787_v46 = vadd.f32 %v5817_v13, %v707_v14  ;;  %v791_v8 = vadd.f32 %v5818_v16, %v707_v14 }
 0x44f   :  { %4697 = vtanh.f32 %v5582_v11 }
 0x458   :  { %v4696_v50 = vpop.eup %4695 }
 0x459   :  { %v2653_v51 = vmul.f32 %v4696_v50, %v2637_v49  ;;  %v5821_v50 = vld [vmem:[#allocation49_spill] sm:$0xff] }
 0x45c   :  { %v4698_v55 = vpop.eup %4697 }
 0x45d   :  { %v2654_v62 = vmul.f32 %v4698_v55, %v2640_v58  ;;  %v5822_v55 = vld [vmem:[#allocation50_spill] sm:$0xff] }
 0x45f   :  { %v2669_v5 = vpack.c.bf16 %v2654_v62, %v2653_v51  ;;  %v5823_v62 = vld [vmem:[#allocation44_spill] sm:$0xff] }
 0x461   :  { %2895 = vmatmul.mubr.bf16.vlgmr.msra.gmra.mxu0 %v2669_v5  ;;  %2938 = vmatmul.mubr.bf16.vlgmr.msra.gmra.mxu1 %v2669_v5 }
 0x462   :  { %3202 = vmatpush1.bf16.msra.mxu0 %v5421_v18  ;;  %3245 = vmatpush1.bf16.msra.mxu1 %v5423_v19 }
 0x463   :  { %3203 = vmatprep.subr.bf16.mxu0 %v5429_v20  ;;  %3246 = vmatprep.subr.bf16.mxu1 %v5431_v21 }
 0x464   :  { %3233 = vmatprep.mubr.bf16.mxu0 %v5792_v10  ;;  %3276 = vmatprep.mubr.bf16.mxu1 %v5792_v10 }
 0x466   :  { %3204 = vmatpush1.bf16.msra.mxu0 %v5433_v22  ;;  %3247 = vmatpush1.bf16.msra.mxu1 %v5435_v23 }
 0x467   :  { %3205 = vmatprep.subr.bf16.mxu0 %v5441_v24  ;;  %3248 = vmatprep.subr.bf16.mxu1 %v5443_v25 }
 0x46a   :  { %3206 = vmatpush1.bf16.msra.mxu0 %v5445_v26  ;;  %3249 = vmatpush1.bf16.msra.mxu1 %v5447_v27 }
 0x46b   :  { %3207 = vmatprep.subr.bf16.mxu0 %v5453_v28  ;;  %3250 = vmatprep.subr.bf16.mxu1 %v5455_v29 }
 0x46e   :  { %3208 = vmatpush1.bf16.msra.mxu0 %v5457_v30  ;;  %3251 = vmatpush1.bf16.msra.mxu1 %v5459_v31 }
 0x46f   :  { %3209 = vmatprep.subr.bf16.mxu0 %v5463_v32  ;;  %3252 = vmatprep.subr.bf16.mxu1 %v5465_v33 }
 0x472   :  { %3210 = vmatpush1.bf16.msra.mxu0 %v5469_v34  ;;  %3253 = vmatpush1.bf16.msra.mxu1 %v5471_v35 }
 0x473   :  { %3211 = vmatprep.subr.bf16.mxu0 %v5475_v36  ;;  %3254 = vmatprep.subr.bf16.mxu1 %v5477_v37 }
 0x476   :  { %3212 = vmatpush1.bf16.msra.mxu0 %v5481_v38  ;;  %3255 = vmatpush1.bf16.msra.mxu1 %v5483_v39 }
 0x477   :  { %3213 = vmatprep.subr.bf16.mxu0 %v5487_v40  ;;  %3256 = vmatprep.subr.bf16.mxu1 %v5489_v41 }
 0x47a   :  { %3214 = vmatpush1.bf16.msra.mxu0 %v5493_v42  ;;  %3257 = vmatpush1.bf16.msra.mxu1 %v5495_v43 }
 0x47b   :  { %3215 = vmatprep.subr.bf16.mxu0 %v5499_v44  ;;  %3258 = vmatprep.subr.bf16.mxu1 %v5501_v45 }
 0x47e   :  { %3216 = vmatpush1.bf16.msra.mxu0 %v5505_v56  ;;  %3259 = vmatpush1.bf16.msra.mxu1 %v5507_v0 }
 0x47f   :  { %3540 = vmatprep.subr.bf16.mxu0 %v5417_v52  ;;  %3583 = vmatprep.subr.bf16.mxu1 %v5419_v17 }
 0x521   :  { %v2896_v7 = vpop.f32.mrf.mxu0  ;;  %v2939_v4 = vpop.f32.mrf.mxu1 }
 0x522   :  { %v2948_v1 = vadd.f32 %v2896_v7, %v787_v46  ;;  %v2950_v5 = vadd.f32 %v2939_v4, %v5823_v62 }
 0x523   :  { %v2898_v9 = vpop.f32.mrf.mxu0  ;;  %v2941_v15 = vpop.f32.mrf.mxu1 }
 0x524   :  { %v2956_v48 = vmul.f32 0.5, %v2948_v1  ;;  %v2949_v6 = vadd.f32 %v2898_v9, %v5819_v57  ;;  %v2951_v61 = vadd.f32 %v2941_v15, %v5820_v3  ;;  %v2958_v1 = vmul.f32 0.5, %v2950_v5 }
 0x525   :  { %v2900_v52 = vpop.f32.mrf.mxu0  ;;  %v2943_v47 = vpop.f32.mrf.mxu1 }
 0x526   :  { %4699 = vtanh.f32 %v2956_v48  ;;  %v2957_v17 = vmul.f32 0.5, %v2949_v6  ;;  %v2952_v53 = vadd.f32 %v2900_v52, %v791_v8  ;;  %v2954_v14 = vadd.f32 %v2943_v47, %v5824_v59 }
 0x527   :  { %v2902_v12 = vpop.f32.mrf.mxu0  ;;  %v2945_v54 = vpop.f32.mrf.mxu1 }
 0x528   :  { %4701 = vtanh.f32 %v2957_v17  ;;  %v2959_v60 = vmul.f32 0.5, %v2952_v53  ;;  %v2953_v49 = vadd.f32 %v2902_v12, %v5821_v50  ;;  %v2955_v51 = vadd.f32 %v2945_v54, %v5822_v55 }
 0x529   :  { %4703 = vtanh.f32 %v2951_v61  ;;  %v2961_v8 = vmul.f32 0.5, %v2954_v14 }
 0x52a   :  { %4705 = vtanh.f32 %v2959_v60  ;;  %v2960_v58 = vmul.f32 0.5, %v2953_v49 }
 0x52c   :  { %4707 = vtanh.f32 %v2960_v58 }
 0x52d   :  { %4709 = vtanh.f32 %v2955_v51 }
 0x52e   :  { %4711 = vtanh.f32 %v2958_v1 }
 0x52f   :  { %4713 = vtanh.f32 %v2961_v8 }
 0x533   :  { %v4700_v13 = vpop.eup %4699 }
 0x534   :  { %v2968_v46 = vmul.f32 0.5, %v4700_v13 }
 0x535   :  { %v4702_v7 = vpop.eup %4701 }
 0x536   :  { %v4704_v9 = vpop.eup %4703  ;;  %v2974_v15 = vadd.f32 0.5, %v2968_v46  ;;  %v2969_v16 = vmul.f32 0.5, %v4702_v7 }
 0x537   :  { %v4706_v48 = vpop.eup %4705 }
 0x538   :  { %v2975_v57 = vadd.f32 0.5, %v2969_v16  ;;  %v2986_v6 = vmul.f32 %v4704_v9, %v2974_v15  ;;  %v2971_v3 = vmul.f32 0.5, %v4706_v48 }
 0x539   :  { %v4708_v61 = vpop.eup %4707 }
 0x53a   :  { %v2984_v52 = vmul.f32 %v2975_v57, %v5578_v2  ;;  %v2977_v17 = vadd.f32 0.5, %v2971_v3  ;;  %v2972_v4 = vmul.f32 0.5, %v4708_v61  ;;  %v4710_v47 = vpop.eup %4709 }
 0x53b   :  { %v4712_v49 = vpop.eup %4711 }
 0x53c   :  { %v5629_v53 = vadd.f32 %v2986_v6, %v2984_v52  ;;  %v2978_v12 = vadd.f32 0.5, %v2972_v4  ;;  %v2987_v54 = vmul.f32 %v4710_v47, %v2977_v17  ;;  %v4714_v58 = vpop.eup %4713  ;;  %v2970_v55 = vmul.f32 0.5, %v4712_v49 }
 0x53d   :  { %v2973_v2 = vmul.f32 0.5, %v4714_v58 }
 0x53e   :  { %v2985_v60 = vmul.f32 %v2978_v12, %v5582_v11  ;;  %4715 = vtanh.f32 %v5629_v53  ;;  %v2976_v62 = vadd.f32 0.5, %v2970_v55  ;;  %v5832_v11 = vld [vmem:[#allocation56_spill] sm:$0xff] }
 0x53f   :  { %v2979_v5 = vadd.f32 0.5, %v2973_v2 }
 0x540   :  { %v5633_v50 = vadd.f32 %v2987_v54, %v2985_v60 }
 0x542   :  { %4717 = vtanh.f32 %v5633_v50 }
 0x54b   :  { %v4716_v51 = vpop.eup %4715 }
 0x54c   :  { %v2992_v14 = vmul.f32 %v4716_v51, %v2976_v62 }
 0x54f   :  { %v4718_v59 = vpop.eup %4717 }
 0x550   :  { %v2993_v13 = vmul.f32 %v4718_v59, %v2979_v5 }
 0x552   :  { %v3008_v46 = vpack.c.bf16 %v2993_v13, %v2992_v14 }
 0x554   :  { %3234 = vmatmul.mubr.bf16.vlgmr.msra.gmra.mxu0 %v3008_v46  ;;  %3277 = vmatmul.mubr.bf16.vlgmr.msra.gmra.mxu1 %v3008_v46 }
 0x555   :  { %3541 = vmatpush1.bf16.msra.mxu0 %v5421_v18  ;;  %3584 = vmatpush1.bf16.msra.mxu1 %v5423_v19  ;;  %v4782_v18 = vld [vmem:[#allocation12] sm:$0xf] }
 0x556   :  { %3542 = vmatprep.subr.bf16.mxu0 %v5429_v20  ;;  %3585 = vmatprep.subr.bf16.mxu1 %v5431_v21  ;;  %v859_v19 = vrot.slane %v4782_v18, %v5345_v63  ;;  %v5825_v20 = vld [vmem:[#allocation51_spill] sm:$0xff] }
 0x557   :  { %3572 = vmatprep.mubr.bf16.mxu0 %v5792_v10  ;;  %3615 = vmatprep.mubr.bf16.mxu1 %v5792_v10 }
 0x558   :  { %v939_v21 = vadd.f32 %v5825_v20, %v859_v19 }
 0x559   :  { %3543 = vmatpush1.bf16.msra.mxu0 %v5433_v22  ;;  %3586 = vmatpush1.bf16.msra.mxu1 %v5435_v23 }
 0x55a   :  { %3544 = vmatprep.subr.bf16.mxu0 %v5441_v24  ;;  %3587 = vmatprep.subr.bf16.mxu1 %v5443_v25 }
 0x55d   :  { %3545 = vmatpush1.bf16.msra.mxu0 %v5445_v26  ;;  %3588 = vmatpush1.bf16.msra.mxu1 %v5447_v27  ;;  %v5826_v27 = vld [vmem:[#allocation55_spill] sm:$0xff] }
 0x55e   :  { %3546 = vmatprep.subr.bf16.mxu0 %v5453_v28  ;;  %3589 = vmatprep.subr.bf16.mxu1 %v5455_v29  ;;  %v943_v28 = vadd.f32 %v5826_v27, %v859_v19  ;;  %v4577_v27 = vld [vmem:[#allocation11 + $0xc0] ss:$16 sps:$4 sm:$0xff]  }
 0x561   :  { %3547 = vmatpush1.bf16.msra.mxu0 %v5457_v30  ;;  %3590 = vmatpush1.bf16.msra.mxu1 %v5459_v31  ;;  %v5827_v30 = vld [vmem:[#allocation53_spill] sm:$0xff] }
 0x562   :  { %3548 = vmatprep.subr.bf16.mxu0 %v5463_v32  ;;  %3591 = vmatprep.subr.bf16.mxu1 %v5465_v33  ;;  %v5828_v32 = vld [vmem:[#allocation54_spill] sm:$0xff] }
 0x565   :  { %3549 = vmatpush1.bf16.msra.mxu0 %v5469_v34  ;;  %3592 = vmatpush1.bf16.msra.mxu1 %v5471_v35 }
 0x566   :  { %3550 = vmatprep.subr.bf16.mxu0 %v5475_v36  ;;  %3593 = vmatprep.subr.bf16.mxu1 %v5477_v37 }
 0x569   :  { %3551 = vmatpush1.bf16.msra.mxu0 %v5481_v38  ;;  %3594 = vmatpush1.bf16.msra.mxu1 %v5483_v39 }
 0x56a   :  { %3552 = vmatprep.subr.bf16.mxu0 %v5487_v40  ;;  %3595 = vmatprep.subr.bf16.mxu1 %v5489_v41  ;;  %v5829_v41 = vld [vmem:[#allocation57_spill] sm:$0xff] }
 0x56d   :  { %3553 = vmatpush1.bf16.msra.mxu0 %v5493_v42  ;;  %3596 = vmatpush1.bf16.msra.mxu1 %v5495_v43 }
 0x56e   :  { %3554 = vmatprep.subr.bf16.mxu0 %v5499_v44  ;;  %3597 = vmatprep.subr.bf16.mxu1 %v5501_v45  ;;  %v5830_v44 = vld [vmem:[#allocation58_spill] sm:$0xff] }
 0x571   :  { %3555 = vmatpush1.bf16.msra.mxu0 %v5505_v56  ;;  %3598 = vmatpush1.bf16.msra.mxu1 %v5507_v0  ;;  %v5831_v56 = vld [vmem:[#allocation52_spill] sm:$0xff] }
 0x614   :  { %v3235_v22 = vpop.f32.mrf.mxu0  ;;  %v3278_v23 = vpop.f32.mrf.mxu1 }
 0x615   :  { %v3287_v24 = vadd.f32 %v3235_v22, %v939_v21  ;;  %v3289_v0 = vadd.f32 %v3278_v23, %v5831_v56  ;;  %v4576_v22 = vld [vmem:[#allocation11 + $0xec] ss:$16 sps:$4 sm:$0xff]   ;;  %v4571_v23 = vld [vmem:[#allocation11 + $0xe0] ss:$16 sps:$4 sm:$0xff]  }
 0x616   :  { %v3237_v25 = vpop.f32.mrf.mxu0  ;;  %v3280_v26 = vpop.f32.mrf.mxu1  ;;  %3922 = vmatprep.subr.bf16.mxu1 %v4576_v22  ;;  %v4607_v56 = vld [vmem:[#allocation11 + $0x20] ss:$16 sps:$4 sm:$0xff]  }
 0x617   :  { %v3295_v29 = vmul.f32 0.5, %v3287_v24  ;;  %v3288_v31 = vadd.f32 %v3237_v25, %v5827_v30  ;;  %v3290_v33 = vadd.f32 %v3280_v26, %v5828_v32  ;;  %v3297_v16 = vmul.f32 0.5, %v3289_v0  ;;  %v4574_v24 = vld [vmem:[#allocation11 + $0xe8] ss:$16 sps:$4 sm:$0xff]   ;;  %v4579_v25 = vld [vmem:[#allocation11 + $0xc4] ss:$16 sps:$4 sm:$0xff]  }
 0x618   :  { %v3239_v34 = vpop.f32.mrf.mxu0  ;;  %v3282_v35 = vpop.f32.mrf.mxu1  ;;  %v4582_v26 = vld [vmem:[#allocation11 + $0xcc] ss:$16 sps:$4 sm:$0xff]   ;;  %v4591_v32 = vld [vmem:[#allocation11 + $0x84] ss:$16 sps:$4 sm:$0xff]   ;;  %v4610_v0 = vld [vmem:[#allocation11 + $0x28] ss:$16 sps:$4 sm:$0xff]  }
 0x619   :  { %4719 = vtanh.f32 %v3295_v29  ;;  %v3296_v36 = vmul.f32 0.5, %v3288_v31  ;;  %v3291_v37 = vadd.f32 %v3239_v34, %v943_v28  ;;  %v3293_v7 = vadd.f32 %v3282_v35, %v5832_v11  ;;  %v4580_v28 = vld [vmem:[#allocation11 + $0xc8] ss:$16 sps:$4 sm:$0xff]   ;;  %v4585_v29 = vld [vmem:[#allocation11 + $0xa4] ss:$16 sps:$4 sm:$0xff]  }
 0x61a   :  { %v3241_v38 = vpop.f32.mrf.mxu0  ;;  %v3284_v39 = vpop.f32.mrf.mxu1  ;;  %v4588_v30 = vld [vmem:[#allocation11 + $0xac] ss:$16 sps:$4 sm:$0xff]   ;;  %v4583_v31 = vld [vmem:[#allocation11 + $0xa0] ss:$16 sps:$4 sm:$0xff]   ;;  %v4592_v35 = vld [vmem:[#allocation11 + $0x88] ss:$16 sps:$4 sm:$0xff]  }
 0x61b   :  { %4721 = vtanh.f32 %v3296_v36  ;;  %v3298_v40 = vmul.f32 0.5, %v3291_v37  ;;  %v3292_v42 = vadd.f32 %v3241_v38, %v5829_v41  ;;  %v3294_v45 = vadd.f32 %v3284_v39, %v5830_v44  ;;  %v4589_v34 = vld [vmem:[#allocation11 + $0x80] ss:$16 sps:$4 sm:$0xff]   ;;  %v4597_v36 = vld [vmem:[#allocation11 + $0x64] ss:$16 sps:$4 sm:$0xff]  }
 0x61c   :  { %4723 = vtanh.f32 %v3290_v33  ;;  %v3300_v6 = vmul.f32 0.5, %v3293_v7  ;;  %v4594_v33 = vld [vmem:[#allocation11 + $0x8c] ss:$16 sps:$4 sm:$0xff]   ;;  %v4595_v38 = vld [vmem:[#allocation11 + $0x60] ss:$16 sps:$4 sm:$0xff]  }
 0x61d   :  { %4725 = vtanh.f32 %v3298_v40  ;;  %v3299_v43 = vmul.f32 0.5, %v3292_v42  ;;  %v4600_v37 = vld [vmem:[#allocation11 + $0x6c] ss:$16 sps:$4 sm:$0xff]   ;;  %v4598_v39 = vld [vmem:[#allocation11 + $0x68] ss:$16 sps:$4 sm:$0xff]  }
 0x61e   :  { %v4603_v40 = vld [vmem:[#allocation11 + $0x44] ss:$16 sps:$4 sm:$0xff]   ;;  %v4606_v41 = vld [vmem:[#allocation11 + $0x4c] ss:$16 sps:$4 sm:$0xff]   ;;  %v4601_v42 = vld [vmem:[#allocation11 + $0x40] ss:$16 sps:$4 sm:$0xff]  }
 0x61f   :  { %4727 = vtanh.f32 %v3299_v43  ;;  %v4604_v43 = vld [vmem:[#allocation11 + $0x48] ss:$16 sps:$4 sm:$0xff]   ;;  %v4609_v44 = vld [vmem:[#allocation11 + $0x24] ss:$16 sps:$4 sm:$0xff]   ;;  %v4618_v7 = vld [vmem:[#allocation11 + $0xc] ss:$16 sps:$4 sm:$0xff]  }
 0x620   :  { %4729 = vtanh.f32 %v3294_v45  ;;  %v4612_v45 = vld [vmem:[#allocation11 + $0x2c] ss:$16 sps:$4 sm:$0xff]   ;;  %v4615_v11 = vld [vmem:[#allocation11 + $0x4] ss:$16 sps:$4 sm:$0xff]  }
 0x621   :  { %4731 = vtanh.f32 %v3297_v16  ;;  %v5840_v22 = vld [vmem:[#allocation64_spill] sm:$0xff] }
 0x622   :  { %4733 = vtanh.f32 %v3300_v6 }
 0x626   :  { %v4720_v1 = vpop.eup %4719 }
 0x627   :  { %v3307_v9 = vmul.f32 0.5, %v4720_v1  ;;  %v4613_v1 = vld [vmem:[#allocation11] ss:$16 sps:$4 sm:$0xff]  }
 0x628   :  { %v4722_v15 = vpop.eup %4721 }
 0x629   :  { %v4724_v8 = vpop.eup %4723  ;;  %v3313_v48 = vadd.f32 0.5, %v3307_v9  ;;  %v3308_v57 = vmul.f32 0.5, %v4722_v15  ;;  %v4616_v9 = vld [vmem:[#allocation11 + $0x8] ss:$16 sps:$4 sm:$0xff]   ;;  %v4783_v15 = vld [vmem:[#allocation12] sm:$0xf] }
 0x62a   :  { %v4726_v3 = vpop.eup %4725  ;;  %v1011_v16 = vrot.slane %v4783_v15, %v5345_v63 }
 0x62b   :  { %v3314_v61 = vadd.f32 0.5, %v3308_v57  ;;  %v3325_v52 = vmul.f32 %v4724_v8, %v3313_v48  ;;  %v3310_v17 = vmul.f32 0.5, %v4726_v3  ;;  %v5833_v8 = vld [vmem:[#allocation59_spill] sm:$0xff] }
 0x62c   :  { %v4728_v4 = vpop.eup %4727  ;;  %v1091_v48 = vadd.f32 %v5833_v8, %v1011_v16 }
 0x62d   :  { %v3323_v47 = vmul.f32 %v3314_v61, %v5629_v53  ;;  %v3316_v12 = vadd.f32 0.5, %v3310_v17  ;;  %v3311_v54 = vmul.f32 0.5, %v4728_v4  ;;  %v4730_v60 = vpop.eup %4729  ;;  %v5834_v17 = vld [vmem:[#allocation63_spill] sm:$0xff] }
 0x62e   :  { %v4732_v62 = vpop.eup %4731  ;;  %v1095_v4 = vadd.f32 %v5834_v17, %v1011_v16 }
 0x62f   :  { %v5678_v49 = vadd.f32 %v3325_v52, %v3323_v47  ;;  %v3317_v58 = vadd.f32 0.5, %v3311_v54  ;;  %v3326_v55 = vmul.f32 %v4730_v60, %v3316_v12  ;;  %v4734_v5 = vpop.eup %4733  ;;  %v3309_v59 = vmul.f32 0.5, %v4732_v62  ;;  %v5835_v12 = vld [vmem:[#allocation61_spill] sm:$0xff]  ;;  %v5836_v60 = vld [vmem:[#allocation62_spill] sm:$0xff] }
 0x630   :  { %v3312_v53 = vmul.f32 0.5, %v4734_v5 }
 0x631   :  { %v3324_v2 = vmul.f32 %v3317_v58, %v5633_v50  ;;  %4735 = vtanh.f32 %v5678_v49  ;;  %v3315_v13 = vadd.f32 0.5, %v3309_v59  ;;  %v4573_v50 = vld [vmem:[#allocation11 + $0xe4] ss:$16 sps:$4 sm:$0xff]  }
 0x632   :  { %v3318_v46 = vadd.f32 0.5, %v3312_v53  ;;  %3879 = vmatprep.subr.bf16.mxu0 %v4573_v50 }
 0x633   :  { %v5682_v51 = vadd.f32 %v3326_v55, %v3324_v2 }
 0x635   :  { %4737 = vtanh.f32 %v5682_v51 }
 0x63e   :  { %v4736_v14 = vpop.eup %4735 }
 0x63f   :  { %v3331_v19 = vmul.f32 %v4736_v14, %v3315_v13  ;;  %v5837_v13 = vld [vmem:[#allocation65_spill] sm:$0xff] }
 0x642   :  { %v4738_v18 = vpop.eup %4737 }
 0x643   :  { %v3332_v20 = vmul.f32 %v4738_v18, %v3318_v46 }
 0x645   :  { %v3347_v21 = vpack.c.bf16 %v3332_v20, %v3331_v19  ;;  %v5838_v19 = vld [vmem:[#allocation66_spill] sm:$0xff] }
 0x647   :  { %3573 = vmatmul.mubr.bf16.vlgmr.msra.gmra.mxu0 %v3347_v21  ;;  %3616 = vmatmul.mubr.bf16.vlgmr.msra.gmra.mxu1 %v3347_v21  ;;  %v5839_v21 = vld [vmem:[#allocation60_spill] sm:$0xff] }
 0x648   :  { %3911 = vmatprep.mubr.bf16.mxu0 %v5792_v10  ;;  %3954 = vmatprep.mubr.bf16.mxu1 %v5792_v10  ;;  %v4586_v10 = vld [vmem:[#allocation11 + $0xa8] ss:$16 sps:$4 sm:$0xff]  }
 0x649   :  { %3880 = vmatpush1.bf16.msra.mxu0 %v4571_v23  ;;  %3923 = vmatpush1.bf16.msra.mxu1 %v4574_v24 }
 0x64a   :  { %3881 = vmatprep.subr.bf16.mxu0 %v4579_v25  ;;  %3924 = vmatprep.subr.bf16.mxu1 %v4582_v26 }
 0x64d   :  { %3882 = vmatpush1.bf16.msra.mxu0 %v4577_v27  ;;  %3925 = vmatpush1.bf16.msra.mxu1 %v4580_v28 }
 0x64e   :  { %3883 = vmatprep.subr.bf16.mxu0 %v4585_v29  ;;  %3926 = vmatprep.subr.bf16.mxu1 %v4588_v30 }
 0x651   :  { %3884 = vmatpush1.bf16.msra.mxu0 %v4583_v31  ;;  %3927 = vmatpush1.bf16.msra.mxu1 %v4586_v10 }
 0x652   :  { %3885 = vmatprep.subr.bf16.mxu0 %v4591_v32  ;;  %3928 = vmatprep.subr.bf16.mxu1 %v4594_v33 }
 0x655   :  { %3886 = vmatpush1.bf16.msra.mxu0 %v4589_v34  ;;  %3929 = vmatpush1.bf16.msra.mxu1 %v4592_v35 }
 0x656   :  { %3887 = vmatprep.subr.bf16.mxu0 %v4597_v36  ;;  %3930 = vmatprep.subr.bf16.mxu1 %v4600_v37 }
 0x659   :  { %3888 = vmatpush1.bf16.msra.mxu0 %v4595_v38  ;;  %3931 = vmatpush1.bf16.msra.mxu1 %v4598_v39 }
 0x65a   :  { %3889 = vmatprep.subr.bf16.mxu0 %v4603_v40  ;;  %3932 = vmatprep.subr.bf16.mxu1 %v4606_v41 }
 0x65d   :  { %3890 = vmatpush1.bf16.msra.mxu0 %v4601_v42  ;;  %3933 = vmatpush1.bf16.msra.mxu1 %v4604_v43 }
 0x65e   :  { %3891 = vmatprep.subr.bf16.mxu0 %v4609_v44  ;;  %3934 = vmatprep.subr.bf16.mxu1 %v4612_v45 }
 0x661   :  { %3892 = vmatpush1.bf16.msra.mxu0 %v4607_v56  ;;  %3935 = vmatpush1.bf16.msra.mxu1 %v4610_v0 }
 0x662   :  { %3893 = vmatprep.subr.bf16.mxu0 %v4615_v11  ;;  %3936 = vmatprep.subr.bf16.mxu1 %v4618_v7 }
 0x665   :  { %3894 = vmatpush1.bf16.msra.mxu0 %v4613_v1  ;;  %3937 = vmatpush1.bf16.msra.mxu1 %v4616_v9 }
 0x707   :  { %v3574_v57 = vpop.f32.mrf.mxu0  ;;  %v3617_v6 = vpop.f32.mrf.mxu1 }
 0x708   :  { %v3626_v3 = vadd.f32 %v3574_v57, %v1091_v48  ;;  %v3628_v50 = vadd.f32 %v3617_v6, %v5839_v21  ;;  %v4091_v48 = vld [vmem:[#allocation5] sm:$0x1]  ;;  %v4784_v57 = vld [vmem:[#allocation12] sm:$0xf] }
 0x709   :  { %v3576_v61 = vpop.f32.mrf.mxu0  ;;  %v3619_v52 = vpop.f32.mrf.mxu1  ;;  %4094 = vperm.xlu0 %4460, %v4091_v48   ;;  %v1163_v6 = vrot.slane %v4784_v57, %v5345_v63 }
 0x70a   :  { %v3634_v47 = vmul.f32 0.5, %v3626_v3  ;;  %v3627_v54 = vadd.f32 %v3576_v61, %v5835_v12  ;;  %v3629_v58 = vadd.f32 %v3619_v52, %v5836_v60  ;;  %v3636_v27 = vmul.f32 0.5, %v3628_v50  ;;  %v5841_v3 = vld [vmem:[#allocation67_spill] sm:$0xff] }
 0x70b   :  { %v3578_v55 = vpop.f32.mrf.mxu0  ;;  %v3621_v2 = vpop.f32.mrf.mxu1  ;;  %v1243_v61 = vadd.f32 %v5841_v3, %v1163_v6 }
 0x70c   :  { %4739 = vtanh.f32 %v3634_v47  ;;  %v3635_v62 = vmul.f32 0.5, %v3627_v54  ;;  %v3630_v5 = vadd.f32 %v3578_v55, %v1095_v4  ;;  %v3632_v23 = vadd.f32 %v3621_v2, %v5840_v22  ;;  %v5842_v54 = vld [vmem:[#allocation71_spill] sm:$0xff]  ;;  %v5843_v55 = vld [vmem:[#allocation69_spill] sm:$0xff]  ;;  %v5846_v22 = vld [vmem:[#allocation74_spill] sm:$0xff] }
 0x70d   :  { %v3580_v59 = vpop.f32.mrf.mxu0  ;;  %v3623_v53 = vpop.f32.mrf.mxu1  ;;  %v1247_v60 = vadd.f32 %v5842_v54, %v1163_v6 }
 0x70e   :  { %4741 = vtanh.f32 %v3635_v62  ;;  %v3637_v14 = vmul.f32 0.5, %v3630_v5  ;;  %v3631_v46 = vadd.f32 %v3580_v59, %v5837_v13  ;;  %v3633_v20 = vadd.f32 %v3623_v53, %v5838_v19  ;;  %v5844_v62 = vld [vmem:[#allocation70_spill] sm:$0xff] }
 0x70f   :  { %4743 = vtanh.f32 %v3629_v58  ;;  %v3639_v31 = vmul.f32 0.5, %v3632_v23 }
 0x710   :  { %4745 = vtanh.f32 %v3637_v14  ;;  %v3638_v18 = vmul.f32 0.5, %v3631_v46 }
 0x712   :  { %4747 = vtanh.f32 %v3638_v18 }
 0x713   :  { %4749 = vtanh.f32 %v3633_v20  ;;  %v5845_v20 = vld [vmem:[#allocation73_spill] sm:$0xff] }
 0x714   :  { %4751 = vtanh.f32 %v3636_v27  ;;  %v5848_v27 = vld [vmem:[#allocation72_spill] sm:$0xff] }
 0x715   :  { %4753 = vtanh.f32 %v3639_v31 }
 0x719   :  { %v4740_v24 = vpop.eup %4739 }
 0x71a   :  { %v3646_v25 = vmul.f32 0.5, %v4740_v24  ;;  %v5847_v24 = vld [vmem:[#allocation68_spill] sm:$0xff] }
 0x71b   :  { %v4742_v26 = vpop.eup %4741 }
 0x71c   :  { %v4744_v28 = vpop.eup %4743  ;;  %v3652_v29 = vadd.f32 0.5, %v3646_v25  ;;  %v3647_v30 = vmul.f32 0.5, %v4742_v26 }
 0x71d   :  { %v4746_v10 = vpop.eup %4745 }
 0x71e   :  { %v3653_v32 = vadd.f32 0.5, %v3647_v30  ;;  %v3664_v33 = vmul.f32 %v4744_v28, %v3652_v29  ;;  %v3649_v34 = vmul.f32 0.5, %v4746_v10 }
 0x71f   :  { %v4748_v35 = vpop.eup %4747 }
 0x720   :  { %v3662_v36 = vmul.f32 %v3653_v32, %v5678_v49  ;;  %v3655_v37 = vadd.f32 0.5, %v3649_v34  ;;  %v3650_v38 = vmul.f32 0.5, %v4748_v35  ;;  %v4750_v39 = vpop.eup %4749 }
 0x721   :  { %v4752_v45 = vpop.eup %4751 }
 0x722   :  { %v5697_v40 = vadd.f32 %v3664_v33, %v3662_v36  ;;  %v3656_v41 = vadd.f32 0.5, %v3650_v38  ;;  %v3665_v42 = vmul.f32 %v4750_v39, %v3655_v37  ;;  %v4754_v56 = vpop.eup %4753  ;;  %v3648_v0 = vmul.f32 0.5, %v4752_v45 }
 0x723   :  { %v3651_v49 = vmul.f32 0.5, %v4754_v56 }
 0x724   :  { %v3663_v43 = vmul.f32 %v3656_v41, %v5682_v51  ;;  %4755 = vtanh.f32 %v5697_v40  ;;  %v3654_v7 = vadd.f32 0.5, %v3648_v0  ;;  %v4903_v51 = vmov 0.0  }
 0x725   :  { %v3657_v1 = vadd.f32 0.5, %v3651_v49  ;;  %4440 = vmatprep.subr.mxu0 %v4903_v51 }
 0x726   :  { %v5701_v44 = vadd.f32 %v3665_v42, %v3663_v43 }
 0x728   :  { %4757 = vtanh.f32 %v5701_v44 }
 0x731   :  { %v4756_v11 = vpop.eup %4755 }
 0x732   :  { %v3670_v15 = vmul.f32 %v4756_v11, %v3654_v7 }
 0x735   :  { %v4758_v9 = vpop.eup %4757 }
 0x736   :  { %v3671_v16 = vmul.f32 %v4758_v9, %v3657_v1 }
 0x738   :  { %v3686_v8 = vpack.c.bf16 %v3671_v16, %v3670_v15 }
 0x73a   :  { %3912 = vmatmul.mubr.bf16.vlgmr.msra.gmra.mxu0 %v3686_v8  ;;  %3955 = vmatmul.mubr.bf16.vlgmr.msra.gmra.mxu1 %v3686_v8 }
 0x73b   :  { %4444 = vmatprep.mubr.msk.f32.mxu0 %vm4904_vm1, %v4903_v51 }
 0x7fa   :  { %v3913_v52 = vpop.f32.mrf.mxu0  ;;  %v3956_v17 = vpop.f32.mrf.mxu1 }
 0x7fb   :  { %v3965_v4 = vadd.f32 %v3913_v52, %v1243_v61  ;;  %v3967_v25 = vadd.f32 %v3956_v17, %v5847_v24  ;;  %v4095_v61 = vpop.permute.xlu0 %4094 }
 0x7fc   :  { %v3915_v47 = vpop.f32.mrf.mxu0  ;;  %v3958_v12 = vpop.f32.mrf.mxu1  ;;  %v4100_v52 = vrot.slane %v4095_v61, %v5345_v63 }
 0x7fd   :  { %v3973_v58 = vmul.f32 0.5, %v3965_v4  ;;  %v3966_v2 = vadd.f32 %v3915_v47, %v5843_v55  ;;  %v3968_v5 = vadd.f32 %v3958_v12, %v5844_v62  ;;  %v3975_v26 = vmul.f32 0.5, %v3967_v25 }
 0x7fe   :  { %v3917_v59 = vpop.f32.mrf.mxu0  ;;  %v3960_v53 = vpop.f32.mrf.mxu1 }
 0x7ff   :  { %4759 = vtanh.f32 %v3973_v58  ;;  %v3974_v14 = vmul.f32 0.5, %v3966_v2  ;;  %v3969_v13 = vadd.f32 %v3917_v59, %v1247_v60  ;;  %v3971_v28 = vadd.f32 %v3960_v53, %v5848_v27 }
 0x800   :  { %v3919_v46 = vpop.f32.mrf.mxu0  ;;  %v3962_v18 = vpop.f32.mrf.mxu1 }
 0x801   :  { %4761 = vtanh.f32 %v3974_v14  ;;  %v3976_v19 = vmul.f32 0.5, %v3969_v13  ;;  %v3970_v21 = vadd.f32 %v3919_v46, %v5845_v20  ;;  %v3972_v23 = vadd.f32 %v3962_v18, %v5846_v22 }
 0x802   :  { %4763 = vtanh.f32 %v3968_v5  ;;  %v3978_v34 = vmul.f32 0.5, %v3971_v28 }
 0x803   :  { %4765 = vtanh.f32 %v3976_v19  ;;  %v3977_v50 = vmul.f32 0.5, %v3970_v21 }
 0x805   :  { %4767 = vtanh.f32 %v3977_v50 }
 0x806   :  { %4769 = vtanh.f32 %v3972_v23 }
 0x807   :  { %4771 = vtanh.f32 %v3975_v26 }
 0x808   :  { %4773 = vtanh.f32 %v3978_v34 }
 0x80c   :  { %v4760_v29 = vpop.eup %4759 }
 0x80d   :  { %v3985_v30 = vmul.f32 0.5, %v4760_v29 }
 0x80e   :  { %v4762_v31 = vpop.eup %4761 }
 0x80f   :  { %v4764_v10 = vpop.eup %4763  ;;  %v3991_v32 = vadd.f32 0.5, %v3985_v30  ;;  %v3986_v33 = vmul.f32 0.5, %v4762_v31 }
 0x810   :  { %v4766_v35 = vpop.eup %4765 }
 0x811   :  { %v3992_v36 = vadd.f32 0.5, %v3986_v33  ;;  %v4003_v37 = vmul.f32 %v4764_v10, %v3991_v32  ;;  %v3988_v38 = vmul.f32 0.5, %v4766_v35 }
 0x812   :  { %v4768_v39 = vpop.eup %4767 }
 0x813   :  { %v4001_v41 = vmul.f32 %v3992_v36, %v5697_v40  ;;  %v3994_v42 = vadd.f32 0.5, %v3988_v38  ;;  %v3989_v43 = vmul.f32 0.5, %v4768_v39  ;;  %v4770_v45 = vpop.eup %4769 }
 0x814   :  { %v4772_v1 = vpop.eup %4771 }
 0x815   :  { %v4005_v56 = vadd.f32 %v4003_v37, %v4001_v41  ;;  %v3995_v0 = vadd.f32 0.5, %v3989_v43  ;;  %v4004_v49 = vmul.f32 %v4770_v45, %v3994_v42  ;;  %v3987_v9 = vmul.f32 0.5, %v4772_v1  ;;  %v4774_v15 = vpop.eup %4773 }
 0x816   :  { %v3990_v8 = vmul.f32 0.5, %v4774_v15 }
 0x817   :  { %4775 = vtanh.f32 %v4005_v56  ;;  %v4002_v11 = vmul.f32 %v3995_v0, %v5701_v44  ;;  %v3993_v16 = vadd.f32 0.5, %v3987_v9  ;;  %v4018_v44 = vld [vmem:[%s5729_s4] sm:$0xff]  ;;  %s4869_s4 = scalar_lea.vmem %s4115_s21, 32 }
 0x818   :  { %v3996_v40 = vadd.f32 0.5, %v3990_v8  ;;  %p4871_p8 = scmp.lt.s32.totalorder %s4869_s4, %s4865_s22 }
 0x819   :  { %v4006_v7 = vadd.f32 %v4004_v49, %v4002_v11 }
 0x81a   :  { %p4872_p9 = por %p4871_p8, %p4870_p7 }
 0x81b   :  { %4777 = vtanh.f32 %v4006_v7 }
 0x81c   :  { %p4873_p10 = pnand %p4872_p9, %p4866_p6 }
 0x824   :  { %v4776_v48 = vpop.eup %4775 }
 0x825   :  { %v4009_v57 = vmul.f32 %v4776_v48, %v3993_v16 }
 0x828   :  { %v4778_v6 = vpop.eup %4777 }
 0x829   :  { %v4010_v3 = vmul.f32 %v4778_v6, %v3996_v40 }
 0x82b   :  { %4441 = vmatpush3.xpose.msra.mxu0 %v4010_v3 }
 0x82c   :  { %4442 = vmatprep.subr.mxu0 %v4903_v51 }
 0x82f   :  { %4443 = vmatpush3.xpose.msra.mxu0 %v4009_v57 }
 0x832   :  { %4445 = vmatmul.mubr.f32.vlgmr.msra.gmra.mxu0 %v4018_v44 }
 0x8f2   :  { %v4087_v17 = vpop.f32.mrf.mxu0 }
 0x8f3   :  { %v4101_v4 = vadd.f32 %v4100_v52, %v4087_v17 }
 0x8f4   :  { %v4446_v47 = vpop.f32.mrf.mxu0 }
 0x8f5   :  { %v4102_v12 = vmul.f32 0.5, %v4101_v4 }
 0x8f7   :  { %4779 = vtanh.f32 %v4102_v12 }
 0x904   :  { %v4780_v54 = vpop.eup %4779 }
 0x905   :  { %v4104_v60 = vmul.f32 0.5, %v4780_v54 }
 0x907   :  { %v4105_v51 = vadd.f32 0.5, %v4104_v60 }
 0x909   :  { %4107 = vst.msk [vmem:[#allocation14] sm:$0x1] %vm4106_vm2, %v4105_v51 }
 0x90a   :  { %4876 = shalt.err (!%p4873_p10)
}
 0x90b   :  { %4117 = dma.vmem_to_hbm [thread:$0]  %s4115_s21, 16, %s5731_s6, [#allocation8]  }
 0x90c   :  { %4891 = dma.done.wait [#allocation8], 16  }
 0x90d   :  { %4892 = vsyncadd [#allocation8], 4294967280 }
 0x90e   :  { %4121 = vsyncpa [#allocation7], 1 }
 0x90f   :  { %4122 = vsyncpa [#allocation10], 1 }
 0x910   :  { %4123 = vsyncpa [#allocation13], 1 }
 0x911   :  { %4124 = vsyncpa [#allocation8], 1 }

</bundles_post_ra>
